<compile_context>
chip_gen: v7x
topology: tpu7x:2x2x1
jax: 0.10.0
libtpu: 0.0.40
codegen_flags: <defaults>
</compile_context>

<pallas_src>
import math
import jax
import jax.numpy as jnp
from jax.experimental import pallas as pl
from jax.experimental.pallas import tpu as pltpu

# ---- small Gemma-like config (synthetic) ----
B = 2           # batch
S = 8           # args.max_len
H = 32          # args.hidden_size
NH = 2          # args.head_nums
HD = 16         # args.head_dim
HD2 = HD // 2
INTER = 64      # mlp intermediate size
VOCAB = 64      # vocab size (embedder rows)
LAYERS = 2
PAD_ID = 0      # tokenizer.pad_id -> CrossEntropyLoss ignore_index
ROPE_THETA = 10000.0
RMS_EPS = 1e-6
MASK_VAL = -2.3819763e38  # Gemma get_masks() fill value
N_TOK = B * S
SQRT_H = float(H) ** 0.5
GELU_C = math.sqrt(2.0 / math.pi)


# ----------------------- fused forward kernel -----------------------
def _fused_forward_kernel(ids_ref, tgt_ref, emb_ref, cos_ref, sin_ref, mask_ref,
                          ln_in_ref, wq_ref, wqr_ref, wk_ref, wkr_ref, wv_ref,
                          wo_ref, ln_post_ref, wg_ref, wu_ref, wd_ref,
                          final_ln_ref, loss_ref):
    f32 = jnp.float32
    dn_tt = (((1,), (1,)), ((), ()))     # contract last dims of both (== A @ B.T)

    # ---- embedding gather as one-hot MXU matmul; sqrt(H) folded into the select ----
    ids = ids_ref[...]                                            # [N, 1] int32
    col_v = jax.lax.broadcasted_iota(jnp.int32, (N_TOK, VOCAB), 1)
    onehot = jnp.where(col_v == ids, f32(SQRT_H), f32(0.0))       # [N, V]
    emb = emb_ref[...]                                            # [V, H]
    h = jnp.dot(onehot, emb, preferred_element_type=f32)          # [N, H]

    cos = cos_ref[...]                                            # [N, HD] full-width
    sin = sin_ref[...]
    mask = mask_ref[...]                                          # [N, N] block-causal

    def rmsnorm(x, w):                                            # Gemma: * (1 + w)
        var = jnp.mean(x * x, axis=-1, keepdims=True)
        return x * jax.lax.rsqrt(var + RMS_EPS) * (1.0 + w)

    for l in range(LAYERS):                                       # static unroll (2)
        # ---------------- attention ----------------
        resid = h
        x = rmsnorm(h, ln_in_ref[l])                              # [N, H]
        attn = jnp.zeros((N_TOK, H), f32)
        for hh in range(NH):                                      # leading-dim weight idx
            q = jnp.dot(x, wq_ref[l, hh], preferred_element_type=f32)      # [N, HD]
            q_sw = jnp.dot(x, wqr_ref[l, hh], preferred_element_type=f32)  # rotate_half(q)
            k = jnp.dot(x, wk_ref[l, hh], preferred_element_type=f32)
            k_sw = jnp.dot(x, wkr_ref[l, hh], preferred_element_type=f32)
            v = jnp.dot(x, wv_ref[l, hh], preferred_element_type=f32)
            q_rot = q * cos + q_sw * sin                          # full-width RoPE
            k_rot = k * cos + k_sw * sin
            # One HD-wide contraction over ALL tokens; the block-diagonal causal mask
            # drives cross-batch pairs to p==0, so one matmul covers every batch.
            scores = jax.lax.dot_general(q_rot, k_rot, dn_tt,
                                         preferred_element_type=f32) + mask
            m = jnp.max(scores, axis=-1, keepdims=True)
            p = jnp.exp(scores - m)
            denom = jnp.sum(p, axis=-1, keepdims=True)
            p = p * pl.reciprocal(denom, approx=True)             # EUP, not VPU divide
            pv = jnp.dot(p, v, preferred_element_type=f32)        # [N, HD]
            # o_proj(concat_heads) == sum_h o_proj_h(head_h): no concat / no scratch.
            attn = attn + jnp.dot(pv, wo_ref[l, hh], preferred_element_type=f32)
        h = resid + attn

        # ---------------- MLP (GeGLU, gelu tanh approx) ----------------
        resid = h
        x = rmsnorm(h, ln_post_ref[l])
        g = jnp.dot(x, wg_ref[l], preferred_element_type=f32)     # [N, INTER]
        u = jnp.dot(x, wu_ref[l], preferred_element_type=f32)
        gelu = 0.5 * g * (1.0 + jnp.tanh(GELU_C * (g + 0.044715 * g * g * g)))
        h = resid + jnp.dot(gelu * u, wd_ref[l], preferred_element_type=f32)

    # ---- final norm + tied LM head (contract emb hidden dim; no emb.T materialized) ----
    h2 = rmsnorm(h, final_ln_ref[...])
    logits = jax.lax.dot_general(h2, emb, dn_tt, preferred_element_type=f32)   # [N, V]

    # ---- shifted cross-entropy, ignore_index = PAD_ID (targets pre-shifted) ----
    tgt = tgt_ref[...]                                            # [N, 1] int32
    m = jnp.max(logits, axis=-1, keepdims=True)
    shifted = logits - m
    lse = jnp.log(jnp.sum(jnp.exp(shifted), axis=-1, keepdims=True))
    true_logit = jnp.sum(jnp.where(col_v == tgt, shifted, f32(0.0)),
                         axis=-1, keepdims=True)
    nll = lse - true_logit                                        # [N, 1]
    valid = (tgt != PAD_ID).astype(f32)                           # [N, 1]
    loss_sum = jnp.sum(nll * valid, axis=0, keepdims=True)        # [1, 1]
    cnt = jnp.sum(valid, axis=0, keepdims=True)                   # [1, 1]
    # TODO(synk): PyTorch CE returns NaN when every target is ignore_index; guard gives 0.
    loss_ref[...] = loss_sum / jnp.maximum(cnt, 1.0)


# ----------------------- JAX glue (constants / params / wrapper) -----------------------
def precompute_rope():
    # TODO(synk): args.train_pi position-interpolation scaling assumed 1.0 (default).
    # TODO(synk): assumes Gemma contiguous real|imag-half RoPE convention.
    inv = 1.0 / (ROPE_THETA ** (jnp.arange(0, HD, 2, dtype=jnp.float32) / HD))
    t = jnp.arange(S, dtype=jnp.float32)
    freqs = jnp.outer(t, inv)                                     # [S, HD/2]
    cos, sin = jnp.cos(freqs), jnp.sin(freqs)
    cos_full = jnp.concatenate([cos, cos], axis=-1)               # [S, HD]
    sin_full = jnp.concatenate([sin, sin], axis=-1)
    # tile over batch so the kernel applies RoPE full-width with zero broadcasts
    return jnp.tile(cos_full, (B, 1)), jnp.tile(sin_full, (B, 1))  # [N_TOK, HD]


def block_causal_mask():
    # Block-diagonal causal mask over all B*S tokens: one [N,N] score matmul per head
    # covers every batch; cross-batch / future pairs get MASK_VAL -> exp -> 0.
    idx = jnp.arange(N_TOK)
    same_batch = (idx[:, None] // S) == (idx[None, :] // S)
    causal = idx[None, :] <= idx[:, None]
    return jnp.where(same_batch & causal, 0.0, MASK_VAL).astype(jnp.float32)


def rotate_half_matrix():
    # R with (q @ R) == rotate_half(q) == [-q2 | q1]  (sign folded in).
    eye = jnp.eye(HD2, dtype=jnp.float32)
    zero = jnp.zeros((HD2, HD2), jnp.float32)
    top = jnp.concatenate([zero, eye], axis=1)    # R[i, i+HD2] = +1
    bot = jnp.concatenate([-eye, zero], axis=1)   # R[i+HD2, i] = -1
    return jnp.concatenate([top, bot], axis=0)    # [HD, HD]


def init_params(key):
    scale = 0.02
    ks = jax.random.split(key, 8)
    return dict(
        emb=jax.random.normal(ks[0], (VOCAB, H), jnp.float32) * scale,
        wq=jax.random.normal(ks[1], (LAYERS, NH, H, HD), jnp.float32) * scale,
        wk=jax.random.normal(ks[2], (LAYERS, NH, H, HD), jnp.float32) * scale,
        wv=jax.random.normal(ks[3], (LAYERS, NH, H, HD), jnp.float32) * scale,
        wo=jax.random.normal(ks[4], (LAYERS, NH, HD, H), jnp.float32) * scale,
        wg=jax.random.normal(ks[5], (LAYERS, H, INTER), jnp.float32) * scale,
        wu=jax.random.normal(ks[6], (LAYERS, H, INTER), jnp.float32) * scale,
        wd=jax.random.normal(ks[7], (LAYERS, INTER, H), jnp.float32) * scale,
        ln_in=jnp.zeros((LAYERS, 1, H), jnp.float32),
        ln_post=jnp.zeros((LAYERS, 1, H), jnp.float32),
        final_ln=jnp.zeros((1, H), jnp.float32),
    )


def train_model_forward(params, input_ids, labels):
    ids = input_ids.reshape(N_TOK, 1).astype(jnp.int32)
    # shift-by-one targets: position t is scored against labels[t+1]; the last position
    # of each sequence gets PAD_ID so it is ignored (== dropping logits[:, -1, :]).
    targets = jnp.concatenate(
        [labels[:, 1:], jnp.full((B, 1), PAD_ID, labels.dtype)], axis=1
    ).reshape(N_TOK, 1).astype(jnp.int32)

    cos_bs, sin_bs = precompute_rope()
    mask = block_causal_mask()

    # Wrapper-side weight folding (zero in-kernel cost):
    #   1/sqrt(HD) attention scale -> q weights; rotate-half permutation -> q/k copies.
    rot = rotate_half_matrix()
    wq_s = params["wq"] * (HD ** -0.5)
    wq_r = wq_s @ rot
    wk = params["wk"]
    wk_r = wk @ rot

    vmem = pl.BlockSpec(memory_space=pltpu.MemorySpace.VMEM)      # whole array, resident
    inputs = (ids, targets, params["emb"], cos_bs, sin_bs, mask,
              params["ln_in"], wq_s, wq_r, wk, wk_r, params["wv"], params["wo"],
              params["ln_post"], params["wg"], params["wu"], params["wd"],
              params["final_ln"])
    loss = pl.pallas_call(
        _fused_forward_kernel,
        out_shape=jax.ShapeDtypeStruct((1, 1), jnp.float32),
        in_specs=[vmem] * len(inputs),
        out_specs=vmem,
    )(*inputs)
    return loss[0, 0]


if __name__ == "__main__":
    key = jax.random.PRNGKey(0)
    pkey, ikey, lkey = jax.random.split(key, 3)
    params = init_params(pkey)
    input_ids = jax.random.randint(ikey, (B, S), 0, VOCAB, dtype=jnp.int32)
    labels = jax.random.randint(lkey, (B, S), 1, VOCAB, dtype=jnp.int32)
    labels = labels.at[0, -1].set(PAD_ID)   # exercise ignore_index path
    loss = jax.jit(train_model_forward)(params, input_ids, labels)
    jax.block_until_ready(loss)
    assert loss.shape == () and bool(jnp.isfinite(loss))
    print("KERNEL_OK")
</pallas_src>

<mosaic_0001>
module attributes {stable_mosaic.version = 11 : i64} {
  func.func @_fused_forward_kernel(%arg0: memref<16x1xi32, #tpu.memory_space<vmem>>, %arg1: memref<16x1xi32, #tpu.memory_space<vmem>>, %arg2: memref<64x32xf32, #tpu.memory_space<vmem>>, %arg3: memref<16x16xf32, #tpu.memory_space<vmem>>, %arg4: memref<16x16xf32, #tpu.memory_space<vmem>>, %arg5: memref<16x16xf32, #tpu.memory_space<vmem>>, %arg6: memref<2x1x32xf32, #tpu.memory_space<vmem>>, %arg7: memref<2x2x32x16xf32, #tpu.memory_space<vmem>>, %arg8: memref<2x2x32x16xf32, #tpu.memory_space<vmem>>, %arg9: memref<2x2x32x16xf32, #tpu.memory_space<vmem>>, %arg10: memref<2x2x32x16xf32, #tpu.memory_space<vmem>>, %arg11: memref<2x2x32x16xf32, #tpu.memory_space<vmem>>, %arg12: memref<2x2x16x32xf32, #tpu.memory_space<vmem>>, %arg13: memref<2x1x32xf32, #tpu.memory_space<vmem>>, %arg14: memref<2x32x64xf32, #tpu.memory_space<vmem>>, %arg15: memref<2x32x64xf32, #tpu.memory_space<vmem>>, %arg16: memref<2x64x32xf32, #tpu.memory_space<vmem>>, %arg17: memref<1x32xf32, #tpu.memory_space<vmem>>, %arg18: memref<1x1xf32, #tpu.memory_space<vmem>>) attributes {dimension_semantics = [], scalar_prefetch = 0 : i64, scratch_operands = 0 : i64, tpu.core_type = #tpu.core_type<tc>} {
    %c0 = arith.constant 0 : index
    %c0_0 = arith.constant 0 : index
    %0 = vector.load %arg0[%c0, %c0_0] : memref<16x1xi32, #tpu.memory_space<vmem>>, vector<16x1xi32>
    %1 = tpu.iota {dimensions = array<i32: 1>} : vector<16x64xi32>
    %2 = vector.broadcast %0 : vector<16x1xi32> to vector<16x64xi32>
    %3 = arith.cmpi eq, %1, %2 : vector<16x64xi32>
    %cst = arith.constant 5.65685415 : f32
    %cst_1 = arith.constant 0.000000e+00 : f32
    %4 = vector.broadcast %cst : f32 to vector<16x64xf32>
    %5 = vector.broadcast %cst_1 : f32 to vector<16x64xf32>
    %6 = arith.select %3, %4, %5 : vector<16x64xi1>, vector<16x64xf32>
    %c0_2 = arith.constant 0 : index
    %c0_3 = arith.constant 0 : index
    %7 = vector.load %arg2[%c0_2, %c0_3] : memref<64x32xf32, #tpu.memory_space<vmem>>, vector<64x32xf32>
    %cst_4 = arith.constant dense<0.000000e+00> : vector<16x32xf32>
    %8 = tpu.matmul %6, %7, %cst_4 {dimension_numbers = #tpu.dot_dimension_numbers<[1], [0], [0], [1], [0, 0, 1, 1], [], []>} : vector<16x64xf32>, vector<64x32xf32>, vector<16x32xf32> -> vector<16x32xf32>
    %c0_5 = arith.constant 0 : index
    %c0_6 = arith.constant 0 : index
    %9 = vector.load %arg3[%c0_5, %c0_6] : memref<16x16xf32, #tpu.memory_space<vmem>>, vector<16x16xf32>
    %c0_7 = arith.constant 0 : index
    %c0_8 = arith.constant 0 : index
    %10 = vector.load %arg4[%c0_7, %c0_8] : memref<16x16xf32, #tpu.memory_space<vmem>>, vector<16x16xf32>
    %c0_9 = arith.constant 0 : index
    %c0_10 = arith.constant 0 : index
    %11 = vector.load %arg5[%c0_9, %c0_10] : memref<16x16xf32, #tpu.memory_space<vmem>>, vector<16x16xf32>
    %c0_11 = arith.constant 0 : index
    %c0_12 = arith.constant 0 : index
    %c0_13 = arith.constant 0 : index
    %12 = vector.load %arg6[%c0_11, %c0_12, %c0_13] : memref<2x1x32xf32, #tpu.memory_space<vmem>>, vector<1x1x32xf32>
    %13 = vector.shape_cast %12 : vector<1x1x32xf32> to vector<1x32xf32>
    %14 = arith.mulf %8, %8 : vector<16x32xf32>
    %cst_14 = arith.constant dense<0.000000e+00> : vector<16xf32>
    %15 = vector.multi_reduction <add>, %14, %cst_14 [1] : vector<16x32xf32> to vector<16xf32>
    %16 = vector.shape_cast %15 : vector<16xf32> to vector<16x1xf32>
    %cst_15 = arith.constant 3.200000e+01 : f32
    %17 = vector.broadcast %cst_15 : f32 to vector<16x1xf32>
    %18 = arith.divf %16, %17 : vector<16x1xf32>
    %cst_16 = arith.constant 9.99999997E-7 : f32
    %19 = vector.broadcast %cst_16 : f32 to vector<16x1xf32>
    %20 = arith.addf %18, %19 : vector<16x1xf32>
    %21 = math.rsqrt %20 : vector<16x1xf32>
    %22 = vector.broadcast %21 : vector<16x1xf32> to vector<16x32xf32>
    %23 = arith.mulf %8, %22 : vector<16x32xf32>
    %cst_17 = arith.constant 1.000000e+00 : f32
    %24 = vector.broadcast %cst_17 : f32 to vector<1x32xf32>
    %25 = arith.addf %24, %13 : vector<1x32xf32>
    %26 = vector.broadcast %25 : vector<1x32xf32> to vector<16x32xf32>
    %27 = arith.mulf %23, %26 : vector<16x32xf32>
    %cst_18 = arith.constant 0.000000e+00 : f32
    %28 = vector.broadcast %cst_18 : f32 to vector<16x32xf32>
    %c0_19 = arith.constant 0 : index
    %c0_20 = arith.constant 0 : index
    %c0_21 = arith.constant 0 : index
    %c0_22 = arith.constant 0 : index
    %29 = vector.load %arg7[%c0_19, %c0_20, %c0_21, %c0_22] : memref<2x2x32x16xf32, #tpu.memory_space<vmem>>, vector<1x1x32x16xf32>
    %30 = vector.shape_cast %29 : vector<1x1x32x16xf32> to vector<32x16xf32>
    %cst_23 = arith.constant dense<0.000000e+00> : vector<16x16xf32>
    %31 = tpu.matmul %27, %30, %cst_23 {dimension_numbers = #tpu.dot_dimension_numbers<[1], [0], [0], [1], [0, 0, 1, 1], [], []>} : vector<16x32xf32>, vector<32x16xf32>, vector<16x16xf32> -> vector<16x16xf32>
    %c0_24 = arith.constant 0 : index
    %c0_25 = arith.constant 0 : index
    %c0_26 = arith.constant 0 : index
    %c0_27 = arith.constant 0 : index
    %32 = vector.load %arg8[%c0_24, %c0_25, %c0_26, %c0_27] : memref<2x2x32x16xf32, #tpu.memory_space<vmem>>, vector<1x1x32x16xf32>
    %33 = vector.shape_cast %32 : vector<1x1x32x16xf32> to vector<32x16xf32>
    %cst_28 = arith.constant dense<0.000000e+00> : vector<16x16xf32>
    %34 = tpu.matmul %27, %33, %cst_28 {dimension_numbers = #tpu.dot_dimension_numbers<[1], [0], [0], [1], [0, 0, 1, 1], [], []>} : vector<16x32xf32>, vector<32x16xf32>, vector<16x16xf32> -> vector<16x16xf32>
    %c0_29 = arith.constant 0 : index
    %c0_30 = arith.constant 0 : index
    %c0_31 = arith.constant 0 : index
    %c0_32 = arith.constant 0 : index
    %35 = vector.load %arg9[%c0_29, %c0_30, %c0_31, %c0_32] : memref<2x2x32x16xf32, #tpu.memory_space<vmem>>, vector<1x1x32x16xf32>
    %36 = vector.shape_cast %35 : vector<1x1x32x16xf32> to vector<32x16xf32>
    %cst_33 = arith.constant dense<0.000000e+00> : vector<16x16xf32>
    %37 = tpu.matmul %27, %36, %cst_33 {dimension_numbers = #tpu.dot_dimension_numbers<[1], [0], [0], [1], [0, 0, 1, 1], [], []>} : vector<16x32xf32>, vector<32x16xf32>, vector<16x16xf32> -> vector<16x16xf32>
    %c0_34 = arith.constant 0 : index
    %c0_35 = arith.constant 0 : index
    %c0_36 = arith.constant 0 : index
    %c0_37 = arith.constant 0 : index
    %38 = vector.load %arg10[%c0_34, %c0_35, %c0_36, %c0_37] : memref<2x2x32x16xf32, #tpu.memory_space<vmem>>, vector<1x1x32x16xf32>
    %39 = vector.shape_cast %38 : vector<1x1x32x16xf32> to vector<32x16xf32>
    %cst_38 = arith.constant dense<0.000000e+00> : vector<16x16xf32>
    %40 = tpu.matmul %27, %39, %cst_38 {dimension_numbers = #tpu.dot_dimension_numbers<[1], [0], [0], [1], [0, 0, 1, 1], [], []>} : vector<16x32xf32>, vector<32x16xf32>, vector<16x16xf32> -> vector<16x16xf32>
    %c0_39 = arith.constant 0 : index
    %c0_40 = arith.constant 0 : index
    %c0_41 = arith.constant 0 : index
    %c0_42 = arith.constant 0 : index
    %41 = vector.load %arg11[%c0_39, %c0_40, %c0_41, %c0_42] : memref<2x2x32x16xf32, #tpu.memory_space<vmem>>, vector<1x1x32x16xf32>
    %42 = vector.shape_cast %41 : vector<1x1x32x16xf32> to vector<32x16xf32>
    %cst_43 = arith.constant dense<0.000000e+00> : vector<16x16xf32>
    %43 = tpu.matmul %27, %42, %cst_43 {dimension_numbers = #tpu.dot_dimension_numbers<[1], [0], [0], [1], [0, 0, 1, 1], [], []>} : vector<16x32xf32>, vector<32x16xf32>, vector<16x16xf32> -> vector<16x16xf32>
    %44 = arith.mulf %31, %9 : vector<16x16xf32>
    %45 = arith.mulf %34, %10 : vector<16x16xf32>
    %46 = arith.addf %44, %45 : vector<16x16xf32>
    %47 = arith.mulf %37, %9 : vector<16x16xf32>
    %48 = arith.mulf %40, %10 : vector<16x16xf32>
    %49 = arith.addf %47, %48 : vector<16x16xf32>
    %cst_44 = arith.constant dense<0.000000e+00> : vector<16x16xf32>
    %50 = tpu.matmul %46, %49, %cst_44 {dimension_numbers = #tpu.dot_dimension_numbers<[1], [1], [0], [0], [0, 0, 1, 0], [], []>} : vector<16x16xf32>, vector<16x16xf32>, vector<16x16xf32> -> vector<16x16xf32>
    %51 = arith.addf %50, %11 : vector<16x16xf32>
    %cst_45 = arith.constant dense<0xFF800000> : vector<16xf32>
    %52 = vector.multi_reduction <maximumf>, %51, %cst_45 [1] : vector<16x16xf32> to vector<16xf32>
    %53 = vector.shape_cast %52 : vector<16xf32> to vector<16x1xf32>
    %54 = vector.broadcast %53 : vector<16x1xf32> to vector<16x16xf32>
    %55 = arith.subf %51, %54 : vector<16x16xf32>
    %56 = math.exp %55 : vector<16x16xf32>
    %cst_46 = arith.constant dense<0.000000e+00> : vector<16xf32>
    %57 = vector.multi_reduction <add>, %56, %cst_46 [1] : vector<16x16xf32> to vector<16xf32>
    %58 = vector.shape_cast %57 : vector<16xf32> to vector<16x1xf32>
    %59 = tpu.reciprocal %58 {approx = true} : vector<16x1xf32> -> vector<16x1xf32>
    %60 = vector.broadcast %59 : vector<16x1xf32> to vector<16x16xf32>
    %61 = arith.mulf %56, %60 : vector<16x16xf32>
    %cst_47 = arith.constant dense<0.000000e+00> : vector<16x16xf32>
    %62 = tpu.matmul %61, %43, %cst_47 {dimension_numbers = #tpu.dot_dimension_numbers<[1], [0], [0], [1], [0, 0, 1, 1], [], []>} : vector<16x16xf32>, vector<16x16xf32>, vector<16x16xf32> -> vector<16x16xf32>
    %c0_48 = arith.constant 0 : index
    %c0_49 = arith.constant 0 : index
    %c0_50 = arith.constant 0 : index
    %c0_51 = arith.constant 0 : index
    %63 = vector.load %arg12[%c0_48, %c0_49, %c0_50, %c0_51] : memref<2x2x16x32xf32, #tpu.memory_space<vmem>>, vector<1x1x16x32xf32>
    %64 = vector.shape_cast %63 : vector<1x1x16x32xf32> to vector<16x32xf32>
    %cst_52 = arith.constant dense<0.000000e+00> : vector<16x32xf32>
    %65 = tpu.matmul %62, %64, %cst_52 {dimension_numbers = #tpu.dot_dimension_numbers<[1], [0], [0], [1], [0, 0, 1, 1], [], []>} : vector<16x16xf32>, vector<16x32xf32>, vector<16x32xf32> -> vector<16x32xf32>
    %66 = arith.addf %28, %65 : vector<16x32xf32>
    %c0_53 = arith.constant 0 : index
    %c1 = arith.constant 1 : index
    %c0_54 = arith.constant 0 : index
    %c0_55 = arith.constant 0 : index
    %67 = vector.load %arg7[%c0_53, %c1, %c0_54, %c0_55] : memref<2x2x32x16xf32, #tpu.memory_space<vmem>>, vector<1x1x32x16xf32>
    %68 = vector.shape_cast %67 : vector<1x1x32x16xf32> to vector<32x16xf32>
    %cst_56 = arith.constant dense<0.000000e+00> : vector<16x16xf32>
    %69 = tpu.matmul %27, %68, %cst_56 {dimension_numbers = #tpu.dot_dimension_numbers<[1], [0], [0], [1], [0, 0, 1, 1], [], []>} : vector<16x32xf32>, vector<32x16xf32>, vector<16x16xf32> -> vector<16x16xf32>
    %c0_57 = arith.constant 0 : index
    %c1_58 = arith.constant 1 : index
    %c0_59 = arith.constant 0 : index
    %c0_60 = arith.constant 0 : index
    %70 = vector.load %arg8[%c0_57, %c1_58, %c0_59, %c0_60] : memref<2x2x32x16xf32, #tpu.memory_space<vmem>>, vector<1x1x32x16xf32>
    %71 = vector.shape_cast %70 : vector<1x1x32x16xf32> to vector<32x16xf32>
    %cst_61 = arith.constant dense<0.000000e+00> : vector<16x16xf32>
    %72 = tpu.matmul %27, %71, %cst_61 {dimension_numbers = #tpu.dot_dimension_numbers<[1], [0], [0], [1], [0, 0, 1, 1], [], []>} : vector<16x32xf32>, vector<32x16xf32>, vector<16x16xf32> -> vector<16x16xf32>
    %c0_62 = arith.constant 0 : index
    %c1_63 = arith.constant 1 : index
    %c0_64 = arith.constant 0 : index
    %c0_65 = arith.constant 0 : index
    %73 = vector.load %arg9[%c0_62, %c1_63, %c0_64, %c0_65] : memref<2x2x32x16xf32, #tpu.memory_space<vmem>>, vector<1x1x32x16xf32>
    %74 = vector.shape_cast %73 : vector<1x1x32x16xf32> to vector<32x16xf32>
    %cst_66 = arith.constant dense<0.000000e+00> : vector<16x16xf32>
    %75 = tpu.matmul %27, %74, %cst_66 {dimension_numbers = #tpu.dot_dimension_numbers<[1], [0], [0], [1], [0, 0, 1, 1], [], []>} : vector<16x32xf32>, vector<32x16xf32>, vector<16x16xf32> -> vector<16x16xf32>
    %c0_67 = arith.constant 0 : index
    %c1_68 = arith.constant 1 : index
    %c0_69 = arith.constant 0 : index
    %c0_70 = arith.constant 0 : index
    %76 = vector.load %arg10[%c0_67, %c1_68, %c0_69, %c0_70] : memref<2x2x32x16xf32, #tpu.memory_space<vmem>>, vector<1x1x32x16xf32>
    %77 = vector.shape_cast %76 : vector<1x1x32x16xf32> to vector<32x16xf32>
    %cst_71 = arith.constant dense<0.000000e+00> : vector<16x16xf32>
    %78 = tpu.matmul %27, %77, %cst_71 {dimension_numbers = #tpu.dot_dimension_numbers<[1], [0], [0], [1], [0, 0, 1, 1], [], []>} : vector<16x32xf32>, vector<32x16xf32>, vector<16x16xf32> -> vector<16x16xf32>
    %c0_72 = arith.constant 0 : index
    %c1_73 = arith.constant 1 : index
    %c0_74 = arith.constant 0 : index
    %c0_75 = arith.constant 0 : index
    %79 = vector.load %arg11[%c0_72, %c1_73, %c0_74, %c0_75] : memref<2x2x32x16xf32, #tpu.memory_space<vmem>>, vector<1x1x32x16xf32>
    %80 = vector.shape_cast %79 : vector<1x1x32x16xf32> to vector<32x16xf32>
    %cst_76 = arith.constant dense<0.000000e+00> : vector<16x16xf32>
    %81 = tpu.matmul %27, %80, %cst_76 {dimension_numbers = #tpu.dot_dimension_numbers<[1], [0], [0], [1], [0, 0, 1, 1], [], []>} : vector<16x32xf32>, vector<32x16xf32>, vector<16x16xf32> -> vector<16x16xf32>
    %82 = arith.mulf %69, %9 : vector<16x16xf32>
    %83 = arith.mulf %72, %10 : vector<16x16xf32>
    %84 = arith.addf %82, %83 : vector<16x16xf32>
    %85 = arith.mulf %75, %9 : vector<16x16xf32>
    %86 = arith.mulf %78, %10 : vector<16x16xf32>
    %87 = arith.addf %85, %86 : vector<16x16xf32>
    %cst_77 = arith.constant dense<0.000000e+00> : vector<16x16xf32>
    %88 = tpu.matmul %84, %87, %cst_77 {dimension_numbers = #tpu.dot_dimension_numbers<[1], [1], [0], [0], [0, 0, 1, 0], [], []>} : vector<16x16xf32>, vector<16x16xf32>, vector<16x16xf32> -> vector<16x16xf32>
    %89 = arith.addf %88, %11 : vector<16x16xf32>
    %cst_78 = arith.constant dense<0xFF800000> : vector<16xf32>
    %90 = vector.multi_reduction <maximumf>, %89, %cst_78 [1] : vector<16x16xf32> to vector<16xf32>
    %91 = vector.shape_cast %90 : vector<16xf32> to vector<16x1xf32>
    %92 = vector.broadcast %91 : vector<16x1xf32> to vector<16x16xf32>
    %93 = arith.subf %89, %92 : vector<16x16xf32>
    %94 = math.exp %93 : vector<16x16xf32>
    %cst_79 = arith.constant dense<0.000000e+00> : vector<16xf32>
    %95 = vector.multi_reduction <add>, %94, %cst_79 [1] : vector<16x16xf32> to vector<16xf32>
    %96 = vector.shape_cast %95 : vector<16xf32> to vector<16x1xf32>
    %97 = tpu.reciprocal %96 {approx = true} : vector<16x1xf32> -> vector<16x1xf32>
    %98 = vector.broadcast %97 : vector<16x1xf32> to vector<16x16xf32>
    %99 = arith.mulf %94, %98 : vector<16x16xf32>
    %cst_80 = arith.constant dense<0.000000e+00> : vector<16x16xf32>
    %100 = tpu.matmul %99, %81, %cst_80 {dimension_numbers = #tpu.dot_dimension_numbers<[1], [0], [0], [1], [0, 0, 1, 1], [], []>} : vector<16x16xf32>, vector<16x16xf32>, vector<16x16xf32> -> vector<16x16xf32>
    %c0_81 = arith.constant 0 : index
    %c1_82 = arith.constant 1 : index
    %c0_83 = arith.constant 0 : index
    %c0_84 = arith.constant 0 : index
    %101 = vector.load %arg12[%c0_81, %c1_82, %c0_83, %c0_84] : memref<2x2x16x32xf32, #tpu.memory_space<vmem>>, vector<1x1x16x32xf32>
    %102 = vector.shape_cast %101 : vector<1x1x16x32xf32> to vector<16x32xf32>
    %cst_85 = arith.constant dense<0.000000e+00> : vector<16x32xf32>
    %103 = tpu.matmul %100, %102, %cst_85 {dimension_numbers = #tpu.dot_dimension_numbers<[1], [0], [0], [1], [0, 0, 1, 1], [], []>} : vector<16x16xf32>, vector<16x32xf32>, vector<16x32xf32> -> vector<16x32xf32>
    %104 = arith.addf %66, %103 : vector<16x32xf32>
    %105 = arith.addf %8, %104 : vector<16x32xf32>
    %c0_86 = arith.constant 0 : index
    %c0_87 = arith.constant 0 : index
    %c0_88 = arith.constant 0 : index
    %106 = vector.load %arg13[%c0_86, %c0_87, %c0_88] : memref<2x1x32xf32, #tpu.memory_space<vmem>>, vector<1x1x32xf32>
    %107 = vector.shape_cast %106 : vector<1x1x32xf32> to vector<1x32xf32>
    %108 = arith.mulf %105, %105 : vector<16x32xf32>
    %cst_89 = arith.constant dense<0.000000e+00> : vector<16xf32>
    %109 = vector.multi_reduction <add>, %108, %cst_89 [1] : vector<16x32xf32> to vector<16xf32>
    %110 = vector.shape_cast %109 : vector<16xf32> to vector<16x1xf32>
    %cst_90 = arith.constant 3.200000e+01 : f32
    %111 = vector.broadcast %cst_90 : f32 to vector<16x1xf32>
    %112 = arith.divf %110, %111 : vector<16x1xf32>
    %cst_91 = arith.constant 9.99999997E-7 : f32
    %113 = vector.broadcast %cst_91 : f32 to vector<16x1xf32>
    %114 = arith.addf %112, %113 : vector<16x1xf32>
    %115 = math.rsqrt %114 : vector<16x1xf32>
    %116 = vector.broadcast %115 : vector<16x1xf32> to vector<16x32xf32>
    %117 = arith.mulf %105, %116 : vector<16x32xf32>
    %cst_92 = arith.constant 1.000000e+00 : f32
    %118 = vector.broadcast %cst_92 : f32 to vector<1x32xf32>
    %119 = arith.addf %118, %107 : vector<1x32xf32>
    %120 = vector.broadcast %119 : vector<1x32xf32> to vector<16x32xf32>
    %121 = arith.mulf %117, %120 : vector<16x32xf32>
    %c0_93 = arith.constant 0 : index
    %c0_94 = arith.constant 0 : index
    %c0_95 = arith.constant 0 : index
    %122 = vector.load %arg14[%c0_93, %c0_94, %c0_95] : memref<2x32x64xf32, #tpu.memory_space<vmem>>, vector<1x32x64xf32>
    %123 = vector.shape_cast %122 : vector<1x32x64xf32> to vector<32x64xf32>
    %cst_96 = arith.constant dense<0.000000e+00> : vector<16x64xf32>
    %124 = tpu.matmul %121, %123, %cst_96 {dimension_numbers = #tpu.dot_dimension_numbers<[1], [0], [0], [1], [0, 0, 1, 1], [], []>} : vector<16x32xf32>, vector<32x64xf32>, vector<16x64xf32> -> vector<16x64xf32>
    %c0_97 = arith.constant 0 : index
    %c0_98 = arith.constant 0 : index
    %c0_99 = arith.constant 0 : index
    %125 = vector.load %arg15[%c0_97, %c0_98, %c0_99] : memref<2x32x64xf32, #tpu.memory_space<vmem>>, vector<1x32x64xf32>
    %126 = vector.shape_cast %125 : vector<1x32x64xf32> to vector<32x64xf32>
    %cst_100 = arith.constant dense<0.000000e+00> : vector<16x64xf32>
    %127 = tpu.matmul %121, %126, %cst_100 {dimension_numbers = #tpu.dot_dimension_numbers<[1], [0], [0], [1], [0, 0, 1, 1], [], []>} : vector<16x32xf32>, vector<32x64xf32>, vector<16x64xf32> -> vector<16x64xf32>
    %cst_101 = arith.constant 5.000000e-01 : f32
    %128 = vector.broadcast %cst_101 : f32 to vector<16x64xf32>
    %129 = arith.mulf %128, %124 : vector<16x64xf32>
    %cst_102 = arith.constant 4.471500e-02 : f32
    %130 = vector.broadcast %cst_102 : f32 to vector<16x64xf32>
    %131 = arith.mulf %130, %124 : vector<16x64xf32>
    %132 = arith.mulf %131, %124 : vector<16x64xf32>
    %133 = arith.mulf %132, %124 : vector<16x64xf32>
    %134 = arith.addf %124, %133 : vector<16x64xf32>
    %cst_103 = arith.constant 0.797884583 : f32
    %135 = vector.broadcast %cst_103 : f32 to vector<16x64xf32>
    %136 = arith.mulf %135, %134 : vector<16x64xf32>
    %137 = math.tanh %136 : vector<16x64xf32>
    %cst_104 = arith.constant 1.000000e+00 : f32
    %138 = vector.broadcast %cst_104 : f32 to vector<16x64xf32>
    %139 = arith.addf %138, %137 : vector<16x64xf32>
    %140 = arith.mulf %129, %139 : vector<16x64xf32>
    %141 = arith.mulf %140, %127 : vector<16x64xf32>
    %c0_105 = arith.constant 0 : index
    %c0_106 = arith.constant 0 : index
    %c0_107 = arith.constant 0 : index
    %142 = vector.load %arg16[%c0_105, %c0_106, %c0_107] : memref<2x64x32xf32, #tpu.memory_space<vmem>>, vector<1x64x32xf32>
    %143 = vector.shape_cast %142 : vector<1x64x32xf32> to vector<64x32xf32>
    %cst_108 = arith.constant dense<0.000000e+00> : vector<16x32xf32>
    %144 = tpu.matmul %141, %143, %cst_108 {dimension_numbers = #tpu.dot_dimension_numbers<[1], [0], [0], [1], [0, 0, 1, 1], [], []>} : vector<16x64xf32>, vector<64x32xf32>, vector<16x32xf32> -> vector<16x32xf32>
    %145 = arith.addf %105, %144 : vector<16x32xf32>
    %c1_109 = arith.constant 1 : index
    %c0_110 = arith.constant 0 : index
    %c0_111 = arith.constant 0 : index
    %146 = vector.load %arg6[%c1_109, %c0_110, %c0_111] : memref<2x1x32xf32, #tpu.memory_space<vmem>>, vector<1x1x32xf32>
    %147 = vector.shape_cast %146 : vector<1x1x32xf32> to vector<1x32xf32>
    %148 = arith.mulf %145, %145 : vector<16x32xf32>
    %cst_112 = arith.constant dense<0.000000e+00> : vector<16xf32>
    %149 = vector.multi_reduction <add>, %148, %cst_112 [1] : vector<16x32xf32> to vector<16xf32>
    %150 = vector.shape_cast %149 : vector<16xf32> to vector<16x1xf32>
    %cst_113 = arith.constant 3.200000e+01 : f32
    %151 = vector.broadcast %cst_113 : f32 to vector<16x1xf32>
    %152 = arith.divf %150, %151 : vector<16x1xf32>
    %cst_114 = arith.constant 9.99999997E-7 : f32
    %153 = vector.broadcast %cst_114 : f32 to vector<16x1xf32>
    %154 = arith.addf %152, %153 : vector<16x1xf32>
    %155 = math.rsqrt %154 : vector<16x1xf32>
    %156 = vector.broadcast %155 : vector<16x1xf32> to vector<16x32xf32>
    %157 = arith.mulf %145, %156 : vector<16x32xf32>
    %cst_115 = arith.constant 1.000000e+00 : f32
    %158 = vector.broadcast %cst_115 : f32 to vector<1x32xf32>
    %159 = arith.addf %158, %147 : vector<1x32xf32>
    %160 = vector.broadcast %159 : vector<1x32xf32> to vector<16x32xf32>
    %161 = arith.mulf %157, %160 : vector<16x32xf32>
    %cst_116 = arith.constant 0.000000e+00 : f32
    %162 = vector.broadcast %cst_116 : f32 to vector<16x32xf32>
    %c1_117 = arith.constant 1 : index
    %c0_118 = arith.constant 0 : index
    %c0_119 = arith.constant 0 : index
    %c0_120 = arith.constant 0 : index
    %163 = vector.load %arg7[%c1_117, %c0_118, %c0_119, %c0_120] : memref<2x2x32x16xf32, #tpu.memory_space<vmem>>, vector<1x1x32x16xf32>
    %164 = vector.shape_cast %163 : vector<1x1x32x16xf32> to vector<32x16xf32>
    %cst_121 = arith.constant dense<0.000000e+00> : vector<16x16xf32>
    %165 = tpu.matmul %161, %164, %cst_121 {dimension_numbers = #tpu.dot_dimension_numbers<[1], [0], [0], [1], [0, 0, 1, 1], [], []>} : vector<16x32xf32>, vector<32x16xf32>, vector<16x16xf32> -> vector<16x16xf32>
    %c1_122 = arith.constant 1 : index
    %c0_123 = arith.constant 0 : index
    %c0_124 = arith.constant 0 : index
    %c0_125 = arith.constant 0 : index
    %166 = vector.load %arg8[%c1_122, %c0_123, %c0_124, %c0_125] : memref<2x2x32x16xf32, #tpu.memory_space<vmem>>, vector<1x1x32x16xf32>
    %167 = vector.shape_cast %166 : vector<1x1x32x16xf32> to vector<32x16xf32>
    %cst_126 = arith.constant dense<0.000000e+00> : vector<16x16xf32>
    %168 = tpu.matmul %161, %167, %cst_126 {dimension_numbers = #tpu.dot_dimension_numbers<[1], [0], [0], [1], [0, 0, 1, 1], [], []>} : vector<16x32xf32>, vector<32x16xf32>, vector<16x16xf32> -> vector<16x16xf32>
    %c1_127 = arith.constant 1 : index
    %c0_128 = arith.constant 0 : index
    %c0_129 = arith.constant 0 : index
    %c0_130 = arith.constant 0 : index
    %169 = vector.load %arg9[%c1_127, %c0_128, %c0_129, %c0_130] : memref<2x2x32x16xf32, #tpu.memory_space<vmem>>, vector<1x1x32x16xf32>
    %170 = vector.shape_cast %169 : vector<1x1x32x16xf32> to vector<32x16xf32>
    %cst_131 = arith.constant dense<0.000000e+00> : vector<16x16xf32>
    %171 = tpu.matmul %161, %170, %cst_131 {dimension_numbers = #tpu.dot_dimension_numbers<[1], [0], [0], [1], [0, 0, 1, 1], [], []>} : vector<16x32xf32>, vector<32x16xf32>, vector<16x16xf32> -> vector<16x16xf32>
    %c1_132 = arith.constant 1 : index
    %c0_133 = arith.constant 0 : index
    %c0_134 = arith.constant 0 : index
    %c0_135 = arith.constant 0 : index
    %172 = vector.load %arg10[%c1_132, %c0_133, %c0_134, %c0_135] : memref<2x2x32x16xf32, #tpu.memory_space<vmem>>, vector<1x1x32x16xf32>
    %173 = vector.shape_cast %172 : vector<1x1x32x16xf32> to vector<32x16xf32>
    %cst_136 = arith.constant dense<0.000000e+00> : vector<16x16xf32>
    %174 = tpu.matmul %161, %173, %cst_136 {dimension_numbers = #tpu.dot_dimension_numbers<[1], [0], [0], [1], [0, 0, 1, 1], [], []>} : vector<16x32xf32>, vector<32x16xf32>, vector<16x16xf32> -> vector<16x16xf32>
    %c1_137 = arith.constant 1 : index
    %c0_138 = arith.constant 0 : index
    %c0_139 = arith.constant 0 : index
    %c0_140 = arith.constant 0 : index
    %175 = vector.load %arg11[%c1_137, %c0_138, %c0_139, %c0_140] : memref<2x2x32x16xf32, #tpu.memory_space<vmem>>, vector<1x1x32x16xf32>
    %176 = vector.shape_cast %175 : vector<1x1x32x16xf32> to vector<32x16xf32>
    %cst_141 = arith.constant dense<0.000000e+00> : vector<16x16xf32>
    %177 = tpu.matmul %161, %176, %cst_141 {dimension_numbers = #tpu.dot_dimension_numbers<[1], [0], [0], [1], [0, 0, 1, 1], [], []>} : vector<16x32xf32>, vector<32x16xf32>, vector<16x16xf32> -> vector<16x16xf32>
    %178 = arith.mulf %165, %9 : vector<16x16xf32>
    %179 = arith.mulf %168, %10 : vector<16x16xf32>
    %180 = arith.addf %178, %179 : vector<16x16xf32>
    %181 = arith.mulf %171, %9 : vector<16x16xf32>
    %182 = arith.mulf %174, %10 : vector<16x16xf32>
    %183 = arith.addf %181, %182 : vector<16x16xf32>
    %cst_142 = arith.constant dense<0.000000e+00> : vector<16x16xf32>
    %184 = tpu.matmul %180, %183, %cst_142 {dimension_numbers = #tpu.dot_dimension_numbers<[1], [1], [0], [0], [0, 0, 1, 0], [], []>} : vector<16x16xf32>, vector<16x16xf32>, vector<16x16xf32> -> vector<16x16xf32>
    %185 = arith.addf %184, %11 : vector<16x16xf32>
    %cst_143 = arith.constant dense<0xFF800000> : vector<16xf32>
    %186 = vector.multi_reduction <maximumf>, %185, %cst_143 [1] : vector<16x16xf32> to vector<16xf32>
    %187 = vector.shape_cast %186 : vector<16xf32> to vector<16x1xf32>
    %188 = vector.broadcast %187 : vector<16x1xf32> to vector<16x16xf32>
    %189 = arith.subf %185, %188 : vector<16x16xf32>
    %190 = math.exp %189 : vector<16x16xf32>
    %cst_144 = arith.constant dense<0.000000e+00> : vector<16xf32>
    %191 = vector.multi_reduction <add>, %190, %cst_144 [1] : vector<16x16xf32> to vector<16xf32>
    %192 = vector.shape_cast %191 : vector<16xf32> to vector<16x1xf32>
    %193 = tpu.reciprocal %192 {approx = true} : vector<16x1xf32> -> vector<16x1xf32>
    %194 = vector.broadcast %193 : vector<16x1xf32> to vector<16x16xf32>
    %195 = arith.mulf %190, %194 : vector<16x16xf32>
    %cst_145 = arith.constant dense<0.000000e+00> : vector<16x16xf32>
    %196 = tpu.matmul %195, %177, %cst_145 {dimension_numbers = #tpu.dot_dimension_numbers<[1], [0], [0], [1], [0, 0, 1, 1], [], []>} : vector<16x16xf32>, vector<16x16xf32>, vector<16x16xf32> -> vector<16x16xf32>
    %c1_146 = arith.constant 1 : index
    %c0_147 = arith.constant 0 : index
    %c0_148 = arith.constant 0 : index
    %c0_149 = arith.constant 0 : index
    %197 = vector.load %arg12[%c1_146, %c0_147, %c0_148, %c0_149] : memref<2x2x16x32xf32, #tpu.memory_space<vmem>>, vector<1x1x16x32xf32>
    %198 = vector.shape_cast %197 : vector<1x1x16x32xf32> to vector<16x32xf32>
    %cst_150 = arith.constant dense<0.000000e+00> : vector<16x32xf32>
    %199 = tpu.matmul %196, %198, %cst_150 {dimension_numbers = #tpu.dot_dimension_numbers<[1], [0], [0], [1], [0, 0, 1, 1], [], []>} : vector<16x16xf32>, vector<16x32xf32>, vector<16x32xf32> -> vector<16x32xf32>
    %200 = arith.addf %162, %199 : vector<16x32xf32>
    %c1_151 = arith.constant 1 : index
    %c1_152 = arith.constant 1 : index
    %c0_153 = arith.constant 0 : index
    %c0_154 = arith.constant 0 : index
    %201 = vector.load %arg7[%c1_151, %c1_152, %c0_153, %c0_154] : memref<2x2x32x16xf32, #tpu.memory_space<vmem>>, vector<1x1x32x16xf32>
    %202 = vector.shape_cast %201 : vector<1x1x32x16xf32> to vector<32x16xf32>
    %cst_155 = arith.constant dense<0.000000e+00> : vector<16x16xf32>
    %203 = tpu.matmul %161, %202, %cst_155 {dimension_numbers = #tpu.dot_dimension_numbers<[1], [0], [0], [1], [0, 0, 1, 1], [], []>} : vector<16x32xf32>, vector<32x16xf32>, vector<16x16xf32> -> vector<16x16xf32>
    %c1_156 = arith.constant 1 : index
    %c1_157 = arith.constant 1 : index
    %c0_158 = arith.constant 0 : index
    %c0_159 = arith.constant 0 : index
    %204 = vector.load %arg8[%c1_156, %c1_157, %c0_158, %c0_159] : memref<2x2x32x16xf32, #tpu.memory_space<vmem>>, vector<1x1x32x16xf32>
    %205 = vector.shape_cast %204 : vector<1x1x32x16xf32> to vector<32x16xf32>
    %cst_160 = arith.constant dense<0.000000e+00> : vector<16x16xf32>
    %206 = tpu.matmul %161, %205, %cst_160 {dimension_numbers = #tpu.dot_dimension_numbers<[1], [0], [0], [1], [0, 0, 1, 1], [], []>} : vector<16x32xf32>, vector<32x16xf32>, vector<16x16xf32> -> vector<16x16xf32>
    %c1_161 = arith.constant 1 : index
    %c1_162 = arith.constant 1 : index
    %c0_163 = arith.constant 0 : index
    %c0_164 = arith.constant 0 : index
    %207 = vector.load %arg9[%c1_161, %c1_162, %c0_163, %c0_164] : memref<2x2x32x16xf32, #tpu.memory_space<vmem>>, vector<1x1x32x16xf32>
    %208 = vector.shape_cast %207 : vector<1x1x32x16xf32> to vector<32x16xf32>
    %cst_165 = arith.constant dense<0.000000e+00> : vector<16x16xf32>
    %209 = tpu.matmul %161, %208, %cst_165 {dimension_numbers = #tpu.dot_dimension_numbers<[1], [0], [0], [1], [0, 0, 1, 1], [], []>} : vector<16x32xf32>, vector<32x16xf32>, vector<16x16xf32> -> vector<16x16xf32>
    %c1_166 = arith.constant 1 : index
    %c1_167 = arith.constant 1 : index
    %c0_168 = arith.constant 0 : index
    %c0_169 = arith.constant 0 : index
    %210 = vector.load %arg10[%c1_166, %c1_167, %c0_168, %c0_169] : memref<2x2x32x16xf32, #tpu.memory_space<vmem>>, vector<1x1x32x16xf32>
    %211 = vector.shape_cast %210 : vector<1x1x32x16xf32> to vector<32x16xf32>
    %cst_170 = arith.constant dense<0.000000e+00> : vector<16x16xf32>
    %212 = tpu.matmul %161, %211, %cst_170 {dimension_numbers = #tpu.dot_dimension_numbers<[1], [0], [0], [1], [0, 0, 1, 1], [], []>} : vector<16x32xf32>, vector<32x16xf32>, vector<16x16xf32> -> vector<16x16xf32>
    %c1_171 = arith.constant 1 : index
    %c1_172 = arith.constant 1 : index
    %c0_173 = arith.constant 0 : index
    %c0_174 = arith.constant 0 : index
    %213 = vector.load %arg11[%c1_171, %c1_172, %c0_173, %c0_174] : memref<2x2x32x16xf32, #tpu.memory_space<vmem>>, vector<1x1x32x16xf32>
    %214 = vector.shape_cast %213 : vector<1x1x32x16xf32> to vector<32x16xf32>
    %cst_175 = arith.constant dense<0.000000e+00> : vector<16x16xf32>
    %215 = tpu.matmul %161, %214, %cst_175 {dimension_numbers = #tpu.dot_dimension_numbers<[1], [0], [0], [1], [0, 0, 1, 1], [], []>} : vector<16x32xf32>, vector<32x16xf32>, vector<16x16xf32> -> vector<16x16xf32>
    %216 = arith.mulf %203, %9 : vector<16x16xf32>
    %217 = arith.mulf %206, %10 : vector<16x16xf32>
    %218 = arith.addf %216, %217 : vector<16x16xf32>
    %219 = arith.mulf %209, %9 : vector<16x16xf32>
    %220 = arith.mulf %212, %10 : vector<16x16xf32>
    %221 = arith.addf %219, %220 : vector<16x16xf32>
    %cst_176 = arith.constant dense<0.000000e+00> : vector<16x16xf32>
    %222 = tpu.matmul %218, %221, %cst_176 {dimension_numbers = #tpu.dot_dimension_numbers<[1], [1], [0], [0], [0, 0, 1, 0], [], []>} : vector<16x16xf32>, vector<16x16xf32>, vector<16x16xf32> -> vector<16x16xf32>
    %223 = arith.addf %222, %11 : vector<16x16xf32>
    %cst_177 = arith.constant dense<0xFF800000> : vector<16xf32>
    %224 = vector.multi_reduction <maximumf>, %223, %cst_177 [1] : vector<16x16xf32> to vector<16xf32>
    %225 = vector.shape_cast %224 : vector<16xf32> to vector<16x1xf32>
    %226 = vector.broadcast %225 : vector<16x1xf32> to vector<16x16xf32>
    %227 = arith.subf %223, %226 : vector<16x16xf32>
    %228 = math.exp %227 : vector<16x16xf32>
    %cst_178 = arith.constant dense<0.000000e+00> : vector<16xf32>
    %229 = vector.multi_reduction <add>, %228, %cst_178 [1] : vector<16x16xf32> to vector<16xf32>
    %230 = vector.shape_cast %229 : vector<16xf32> to vector<16x1xf32>
    %231 = tpu.reciprocal %230 {approx = true} : vector<16x1xf32> -> vector<16x1xf32>
    %232 = vector.broadcast %231 : vector<16x1xf32> to vector<16x16xf32>
    %233 = arith.mulf %228, %232 : vector<16x16xf32>
    %cst_179 = arith.constant dense<0.000000e+00> : vector<16x16xf32>
    %234 = tpu.matmul %233, %215, %cst_179 {dimension_numbers = #tpu.dot_dimension_numbers<[1], [0], [0], [1], [0, 0, 1, 1], [], []>} : vector<16x16xf32>, vector<16x16xf32>, vector<16x16xf32> -> vector<16x16xf32>
    %c1_180 = arith.constant 1 : index
    %c1_181 = arith.constant 1 : index
    %c0_182 = arith.constant 0 : index
    %c0_183 = arith.constant 0 : index
    %235 = vector.load %arg12[%c1_180, %c1_181, %c0_182, %c0_183] : memref<2x2x16x32xf32, #tpu.memory_space<vmem>>, vector<1x1x16x32xf32>
    %236 = vector.shape_cast %235 : vector<1x1x16x32xf32> to vector<16x32xf32>
    %cst_184 = arith.constant dense<0.000000e+00> : vector<16x32xf32>
    %237 = tpu.matmul %234, %236, %cst_184 {dimension_numbers = #tpu.dot_dimension_numbers<[1], [0], [0], [1], [0, 0, 1, 1], [], []>} : vector<16x16xf32>, vector<16x32xf32>, vector<16x32xf32> -> vector<16x32xf32>
    %238 = arith.addf %200, %237 : vector<16x32xf32>
    %239 = arith.addf %145, %238 : vector<16x32xf32>
    %c1_185 = arith.constant 1 : index
    %c0_186 = arith.constant 0 : index
    %c0_187 = arith.constant 0 : index
    %240 = vector.load %arg13[%c1_185, %c0_186, %c0_187] : memref<2x1x32xf32, #tpu.memory_space<vmem>>, vector<1x1x32xf32>
    %241 = vector.shape_cast %240 : vector<1x1x32xf32> to vector<1x32xf32>
    %242 = arith.mulf %239, %239 : vector<16x32xf32>
    %cst_188 = arith.constant dense<0.000000e+00> : vector<16xf32>
    %243 = vector.multi_reduction <add>, %242, %cst_188 [1] : vector<16x32xf32> to vector<16xf32>
    %244 = vector.shape_cast %243 : vector<16xf32> to vector<16x1xf32>
    %cst_189 = arith.constant 3.200000e+01 : f32
    %245 = vector.broadcast %cst_189 : f32 to vector<16x1xf32>
    %246 = arith.divf %244, %245 : vector<16x1xf32>
    %cst_190 = arith.constant 9.99999997E-7 : f32
    %247 = vector.broadcast %cst_190 : f32 to vector<16x1xf32>
    %248 = arith.addf %246, %247 : vector<16x1xf32>
    %249 = math.rsqrt %248 : vector<16x1xf32>
    %250 = vector.broadcast %249 : vector<16x1xf32> to vector<16x32xf32>
    %251 = arith.mulf %239, %250 : vector<16x32xf32>
    %cst_191 = arith.constant 1.000000e+00 : f32
    %252 = vector.broadcast %cst_191 : f32 to vector<1x32xf32>
    %253 = arith.addf %252, %241 : vector<1x32xf32>
    %254 = vector.broadcast %253 : vector<1x32xf32> to vector<16x32xf32>
    %255 = arith.mulf %251, %254 : vector<16x32xf32>
    %c1_192 = arith.constant 1 : index
    %c0_193 = arith.constant 0 : index
    %c0_194 = arith.constant 0 : index
    %256 = vector.load %arg14[%c1_192, %c0_193, %c0_194] : memref<2x32x64xf32, #tpu.memory_space<vmem>>, vector<1x32x64xf32>
    %257 = vector.shape_cast %256 : vector<1x32x64xf32> to vector<32x64xf32>
    %cst_195 = arith.constant dense<0.000000e+00> : vector<16x64xf32>
    %258 = tpu.matmul %255, %257, %cst_195 {dimension_numbers = #tpu.dot_dimension_numbers<[1], [0], [0], [1], [0, 0, 1, 1], [], []>} : vector<16x32xf32>, vector<32x64xf32>, vector<16x64xf32> -> vector<16x64xf32>
    %c1_196 = arith.constant 1 : index
    %c0_197 = arith.constant 0 : index
    %c0_198 = arith.constant 0 : index
    %259 = vector.load %arg15[%c1_196, %c0_197, %c0_198] : memref<2x32x64xf32, #tpu.memory_space<vmem>>, vector<1x32x64xf32>
    %260 = vector.shape_cast %259 : vector<1x32x64xf32> to vector<32x64xf32>
    %cst_199 = arith.constant dense<0.000000e+00> : vector<16x64xf32>
    %261 = tpu.matmul %255, %260, %cst_199 {dimension_numbers = #tpu.dot_dimension_numbers<[1], [0], [0], [1], [0, 0, 1, 1], [], []>} : vector<16x32xf32>, vector<32x64xf32>, vector<16x64xf32> -> vector<16x64xf32>
    %cst_200 = arith.constant 5.000000e-01 : f32
    %262 = vector.broadcast %cst_200 : f32 to vector<16x64xf32>
    %263 = arith.mulf %262, %258 : vector<16x64xf32>
    %cst_201 = arith.constant 4.471500e-02 : f32
    %264 = vector.broadcast %cst_201 : f32 to vector<16x64xf32>
    %265 = arith.mulf %264, %258 : vector<16x64xf32>
    %266 = arith.mulf %265, %258 : vector<16x64xf32>
    %267 = arith.mulf %266, %258 : vector<16x64xf32>
    %268 = arith.addf %258, %267 : vector<16x64xf32>
    %cst_202 = arith.constant 0.797884583 : f32
    %269 = vector.broadcast %cst_202 : f32 to vector<16x64xf32>
    %270 = arith.mulf %269, %268 : vector<16x64xf32>
    %271 = math.tanh %270 : vector<16x64xf32>
    %cst_203 = arith.constant 1.000000e+00 : f32
    %272 = vector.broadcast %cst_203 : f32 to vector<16x64xf32>
    %273 = arith.addf %272, %271 : vector<16x64xf32>
    %274 = arith.mulf %263, %273 : vector<16x64xf32>
    %275 = arith.mulf %274, %261 : vector<16x64xf32>
    %c1_204 = arith.constant 1 : index
    %c0_205 = arith.constant 0 : index
    %c0_206 = arith.constant 0 : index
    %276 = vector.load %arg16[%c1_204, %c0_205, %c0_206] : memref<2x64x32xf32, #tpu.memory_space<vmem>>, vector<1x64x32xf32>
    %277 = vector.shape_cast %276 : vector<1x64x32xf32> to vector<64x32xf32>
    %cst_207 = arith.constant dense<0.000000e+00> : vector<16x32xf32>
    %278 = tpu.matmul %275, %277, %cst_207 {dimension_numbers = #tpu.dot_dimension_numbers<[1], [0], [0], [1], [0, 0, 1, 1], [], []>} : vector<16x64xf32>, vector<64x32xf32>, vector<16x32xf32> -> vector<16x32xf32>
    %279 = arith.addf %239, %278 : vector<16x32xf32>
    %c0_208 = arith.constant 0 : index
    %c0_209 = arith.constant 0 : index
    %280 = vector.load %arg17[%c0_208, %c0_209] : memref<1x32xf32, #tpu.memory_space<vmem>>, vector<1x32xf32>
    %281 = arith.mulf %279, %279 : vector<16x32xf32>
    %cst_210 = arith.constant dense<0.000000e+00> : vector<16xf32>
    %282 = vector.multi_reduction <add>, %281, %cst_210 [1] : vector<16x32xf32> to vector<16xf32>
    %283 = vector.shape_cast %282 : vector<16xf32> to vector<16x1xf32>
    %cst_211 = arith.constant 3.200000e+01 : f32
    %284 = vector.broadcast %cst_211 : f32 to vector<16x1xf32>
    %285 = arith.divf %283, %284 : vector<16x1xf32>
    %cst_212 = arith.constant 9.99999997E-7 : f32
    %286 = vector.broadcast %cst_212 : f32 to vector<16x1xf32>
    %287 = arith.addf %285, %286 : vector<16x1xf32>
    %288 = math.rsqrt %287 : vector<16x1xf32>
    %289 = vector.broadcast %288 : vector<16x1xf32> to vector<16x32xf32>
    %290 = arith.mulf %279, %289 : vector<16x32xf32>
    %cst_213 = arith.constant 1.000000e+00 : f32
    %291 = vector.broadcast %cst_213 : f32 to vector<1x32xf32>
    %292 = arith.addf %291, %280 : vector<1x32xf32>
    %293 = vector.broadcast %292 : vector<1x32xf32> to vector<16x32xf32>
    %294 = arith.mulf %290, %293 : vector<16x32xf32>
    %cst_214 = arith.constant dense<0.000000e+00> : vector<16x64xf32>
    %295 = tpu.matmul %294, %7, %cst_214 {dimension_numbers = #tpu.dot_dimension_numbers<[1], [1], [0], [0], [0, 0, 1, 0], [], []>} : vector<16x32xf32>, vector<64x32xf32>, vector<16x64xf32> -> vector<16x64xf32>
    %c0_215 = arith.constant 0 : index
    %c0_216 = arith.constant 0 : index
    %296 = vector.load %arg1[%c0_215, %c0_216] : memref<16x1xi32, #tpu.memory_space<vmem>>, vector<16x1xi32>
    %cst_217 = arith.constant dense<0xFF800000> : vector<16xf32>
    %297 = vector.multi_reduction <maximumf>, %295, %cst_217 [1] : vector<16x64xf32> to vector<16xf32>
    %298 = vector.shape_cast %297 : vector<16xf32> to vector<16x1xf32>
    %299 = vector.broadcast %298 : vector<16x1xf32> to vector<16x64xf32>
    %300 = arith.subf %295, %299 : vector<16x64xf32>
    %301 = math.exp %300 : vector<16x64xf32>
    %cst_218 = arith.constant dense<0.000000e+00> : vector<16xf32>
    %302 = vector.multi_reduction <add>, %301, %cst_218 [1] : vector<16x64xf32> to vector<16xf32>
    %303 = vector.shape_cast %302 : vector<16xf32> to vector<16x1xf32>
    %304 = math.log %303 : vector<16x1xf32>
    %305 = vector.broadcast %296 : vector<16x1xi32> to vector<16x64xi32>
    %306 = arith.cmpi eq, %1, %305 : vector<16x64xi32>
    %cst_219 = arith.constant 0.000000e+00 : f32
    %307 = vector.broadcast %cst_219 : f32 to vector<16x64xf32>
    %308 = arith.select %306, %300, %307 : vector<16x64xi1>, vector<16x64xf32>
    %cst_220 = arith.constant dense<0.000000e+00> : vector<16xf32>
    %309 = vector.multi_reduction <add>, %308, %cst_220 [1] : vector<16x64xf32> to vector<16xf32>
    %310 = vector.shape_cast %309 : vector<16xf32> to vector<16x1xf32>
    %311 = arith.subf %304, %310 : vector<16x1xf32>
    %c0_i32 = arith.constant 0 : i32
    %312 = vector.broadcast %c0_i32 : i32 to vector<16x1xi32>
    %313 = arith.cmpi ne, %296, %312 : vector<16x1xi32>
    %314 = arith.extui %313 : vector<16x1xi1> to vector<16x1xi32>
    %315 = arith.sitofp %314 : vector<16x1xi32> to vector<16x1xf32>
    %316 = arith.mulf %311, %315 : vector<16x1xf32>
    %cst_221 = arith.constant dense<0.000000e+00> : vector<1xf32>
    %317 = vector.multi_reduction <add>, %316, %cst_221 [0] : vector<16x1xf32> to vector<1xf32>
    %318 = vector.shape_cast %317 : vector<1xf32> to vector<1x1xf32>
    %cst_222 = arith.constant dense<0.000000e+00> : vector<1xf32>
    %319 = vector.multi_reduction <add>, %315, %cst_222 [0] : vector<16x1xf32> to vector<1xf32>
    %320 = vector.shape_cast %319 : vector<1xf32> to vector<1x1xf32>
    %cst_223 = arith.constant 1.000000e+00 : f32
    %321 = vector.broadcast %cst_223 : f32 to vector<1x1xf32>
    %322 = arith.maximumf %320, %321 : vector<1x1xf32>
    %323 = arith.divf %318, %322 : vector<1x1xf32>
    %c0_224 = arith.constant 0 : index
    %c0_225 = arith.constant 0 : index
    %324 = vector.load %arg18[%c0_224, %c0_225] : memref<1x1xf32, #tpu.memory_space<vmem>>, vector<1x1xf32>
    tpu.vector_store %arg18[%c0_224, %c0_225], %323 {strides = array<i32>} : memref<1x1xf32, #tpu.memory_space<vmem>>, vector<1x1xf32>,
    return
  }
}

</mosaic_0001>

<bundles_post_ra>
// kernel: train_model_forward.1
= control target key start
LH: loop header
LB: loop body
LE: loop exit
PB: predicated region body
PF: predicated region fallthrough
CT: control target
= control target key end

     0   :  { %s5976_s0 = inlined_call_operand.vmem [shape: s32[16,1], index: 0, kind: input, shape index: {}]   ;;  %s5977_s1 = inlined_call_operand.vmem [shape: s32[16,1], index: 1, kind: input, shape index: {}]   ;;  %s5978_s2 = inlined_call_operand.vmem [shape: f32[64,32], index: 2, kind: input, shape index: {}]   ;;  %s5979_s3 = inlined_call_operand.vmem [shape: f32[16,16], index: 3, kind: input, shape index: {}]   ;;  %s5980_s4 = inlined_call_operand.vmem [shape: f32[16,16], index: 4, kind: input, shape index: {}]   ;;  %s5981_s5 = inlined_call_operand.vmem [shape: f32[16,16], index: 5, kind: input, shape index: {}]   ;;  %s5982_s6 = inlined_call_operand.vmem [shape: f32[2,1,32], index: 6, kind: input, shape index: {}]   ;;  %s5983_s7 = inlined_call_operand.vmem [shape: f32[2,2,32,16], index: 7, kind: input, shape index: {}]   ;;  %s5984_s8 = inlined_call_operand.vmem [shape: f32[2,2,32,16], index: 8, kind: input, shape index: {}]   ;;  %s5985_s9 = inlined_call_operand.vmem [shape: f32[2,2,32,16], index: 9, kind: input, shape index: {}]   ;;  %s5986_s10 = inlined_call_operand.vmem [shape: f32[2,2,32,16], index: 10, kind: input, shape index: {}]   ;;  %s5987_s11 = inlined_call_operand.vmem [shape: f32[2,2,32,16], index: 11, kind: input, shape index: {}]   ;;  %s5988_s12 = inlined_call_operand.vmem [shape: f32[2,2,16,32], index: 12, kind: input, shape index: {}]   ;;  %s5989_s13 = inlined_call_operand.vmem [shape: f32[2,1,32], index: 13, kind: input, shape index: {}]   ;;  %s5990_s14 = inlined_call_operand.vmem [shape: f32[2,32,64], index: 14, kind: input, shape index: {}]   ;;  %s5991_s15 = inlined_call_operand.vmem [shape: f32[2,32,64], index: 15, kind: input, shape index: {}]   ;;  %s5992_s16 = inlined_call_operand.vmem [shape: f32[2,64,32], index: 16, kind: input, shape index: {}]   ;;  %s5993_s17 = inlined_call_operand.vmem [shape: f32[1,32], index: 17, kind: input, shape index: {}]   ;;  %s5994_s18 = inlined_call_operand.hbm [shape: f32[1,1], index: 18, kind: output, shape index: {}]  }
   0x1   :  { %5999 = sst [smem:[#allocation5_spill]] %s5976_s0 }
   0x2   :  { %6000 = sst [smem:[#allocation6_spill]] %s5977_s1 }
   0x3   :  { %6001 = sst [smem:[#allocation7_spill]] %s5978_s2 }
   0x4   :  { %6002 = sst [smem:[#allocation8_spill]] %s5989_s13 }
   0x5   :  { %s6003_s29 = sld [smem:[#allocation5_spill]]  ;;  %s6004_s13 = sld [smem:[#allocation7_spill]]  ;;  %v5070_v2 = vmov 0  }
   0x6   :  { %4970 = vset.pattern.permute.xlu0 %v5070_v2  ;;  %4971 = vset.pattern.permute.xlu1 %v5070_v2 }
   0xb   :  { %v60_v0 = vld [vmem:[%s6003_s29] sm:$0xff]  ;;  %v75_v3 = vld [vmem:[%s6004_s13 + $0x8] sm:$0xff]  ;;  %v76_v4 = vld [vmem:[%s6004_s13 + $0x10] sm:$0xff] }
   0xc   :  { %v74_v1 = vld [vmem:[%s6004_s13] sm:$0xff]  ;;  %v77_v5 = vld [vmem:[%s6004_s13 + $0x18] sm:$0xff]  ;;  %65 = vperm.xlu0 %4970, %v60_v0   ;;  %v61_v6 = vld [vmem:[%s6003_s29 + $0x8] sm:$0xff] }
   0xd   :  { %v5186_v7 = vpack.c.bf16 %v75_v3, %v74_v1  ;;  %v5188_v8 = vpack.c.bf16 %v77_v5, %v76_v4  ;;  %v78_v9 = vld [vmem:[%s6004_s13 + $0x20] sm:$0xff]  ;;  %v79_v10 = vld [vmem:[%s6004_s13 + $0x28] sm:$0xff] }
   0xe   :  { %23 = vsyncpa [#allocation3], 0  ;;  %v5199_v11 = vpack.c.bf16 %v79_v10, %v78_v9  ;;  %v80_v12 = vld [vmem:[%s6004_s13 + $0x30] sm:$0xff]  ;;  %v81_v13 = vld [vmem:[%s6004_s13 + $0x38] sm:$0xff]  ;;  %v62_v15 = vlaneseq  ;;  %vm82_vm0 = vcmask 523264   ;;  %v5071_v18 = vmov 0.0  }
   0xf   :  { %4644 = vmatprep.subr.bf16.mxu1 %v5186_v7  ;;  %v5209_v14 = vpack.c.bf16 %v81_v13, %v80_v12  ;;  %vm173_vm3 = vcmask 261120   ;;  %v198_v28 = vld [vmem:[%s5983_s7] sm:$0xff]  ;;  %v199_v29 = vld [vmem:[%s5983_s7 + $0x8] sm:$0xff]  ;;  %v200_v34 = vld [vmem:[%s5983_s7 + $0x10] sm:$0xff]  ;;  %vm611_vm4 = vcmask 130048   ;;  %s6007_s2 = sld [smem:[#allocation8_spill]] }
  0x10   :  { %4646 = vmatpush3.bf16.msra.mxu1 %v5186_v7  ;;  %68 = vperm.xlu0 %4970, %v61_v6   ;;  %v5214_v16 = vand.u32 127, %v62_v15  ;;  %v362_v30 = vld [vmem:[%s5985_s9] sm:$0xff]  ;;  %v4659_v31 = vpack.c.bf16 %v199_v29, %v198_v28  ;;  %v363_v32 = vld [vmem:[%s5985_s9 + $0x8] sm:$0xff]  ;;  %v201_v35 = vld [vmem:[%s5983_s7 + $0x18] sm:$0xff]  ;;  %v192_v51 = vshrl.u32 %v62_v15, 7  ;;  %vm3767_vm11 = vcmask 7168  }
  0x11   :  { %4648 = vmatprep.subr.bf16.mxu1 %v5188_v8  ;;  %v4675_v33 = vpack.c.bf16 %v363_v32, %v362_v30  ;;  %v364_v36 = vld [vmem:[%s5985_s9 + $0x10] sm:$0xff]  ;;  %v4663_v37 = vpack.c.bf16 %v201_v35, %v200_v34  ;;  %v365_v38 = vld [vmem:[%s5985_s9 + $0x18] sm:$0xff]  ;;  %v283_v40 = vld [vmem:[%s5984_s8] sm:$0xff]  ;;  %s5072_s19 = smov [#allocation2]   ;;  %vm3789_vm12 = vcmask 0  }
  0x12   :  { %v4679_v39 = vpack.c.bf16 %v365_v38, %v364_v36  ;;  %v284_v41 = vld [vmem:[%s5984_s8 + $0x8] sm:$0xff]  ;;  %v520_v42 = vld [vmem:[%s5987_s11] sm:$0xff]  ;;  %v5271_v54 = vsub.s32 0, %v192_v51  ;;  %v285_v61 = vld [vmem:[%s5984_s8 + $0x10] sm:$0xff]  ;;  %s3797_s13 = sshll.u32 %s5072_s19, 4  ;;  %s3798_s13 = int_to_ptr.vmem [resolvable:$true] %s3797_s13 }
  0x13   :  { %4676 = vmatprep.subr.bf16.mxu0 %v4675_v33  ;;  %v4667_v43 = vpack.c.bf16 %v284_v41, %v283_v40  ;;  %v521_v44 = vld [vmem:[%s5987_s11 + $0x8] sm:$0xff]  ;;  %v170_v52 = vld [vmem:[%s5982_s6] sm:$0x1]  ;;  %v286_v63 = vld [vmem:[%s5984_s8 + $0x18] sm:$0xff]  ;;  %s5046_s1 = scalar_lea.vmem %s3798_s13, 16  ;;  %s5050_s20 = scalar_lea.vmem %s3798_s13, 32 }
  0x14   :  { %4650 = vmatpush3.bf16.msra.mxu1 %v5188_v8  ;;  %4678 = vmatpush3.bf16.msra.mxu0 %v4675_v33  ;;  %v4691_v45 = vpack.c.bf16 %v521_v44, %v520_v42  ;;  %v189_v55 = vadd.f32 1.0, %v170_v52  ;;  %v522_v0 = vld [vmem:[%s5987_s11 + $0x10] sm:$0xff]  ;;  %v523_v1 = vld [vmem:[%s5987_s11 + $0x18] sm:$0xff]  ;;  %v4671_v3 = vpack.c.bf16 %v286_v63, %v285_v61  ;;  %v441_v5 = vld [vmem:[%s5986_s10] sm:$0xff]  ;;  %p5047_p0 = scmp.ne.s32.totalorder %s3798_s13, %s5046_s1  ;;  %p5051_p1 = scmp.lt.s32.totalorder %s3798_s13, %s3798_s13 }
  0x15   :  { %4652 = vmatprep.subr.bf16.mxu1 %v5199_v11  ;;  %4680 = vmatprep.subr.bf16.mxu0 %v4679_v39  ;;  %v4695_v4 = vpack.c.bf16 %v523_v1, %v522_v0  ;;  %v442_v6 = vld [vmem:[%s5986_s10 + $0x8] sm:$0xff]  ;;  %v443_v10 = vld [vmem:[%s5986_s10 + $0x10] sm:$0xff]  ;;  %v444_v12 = vld [vmem:[%s5986_s10 + $0x18] sm:$0xff]  ;;  %p5052_p2 = scmp.lt.s32.totalorder %s5050_s20, %s5046_s1 }
  0x16   :  { %v194_v56 = vrot.slane %v189_v55, %v5271_v54  ;;  %v4683_v9 = vpack.c.bf16 %v442_v6, %v441_v5  ;;  %v4687_v13 = vpack.c.bf16 %v444_v12, %v443_v10  ;;  %vm5361_vm5 = vmpackc.low %vm611_vm4, %vm611_vm4  ;;  %v3825_v51 = vld [vmem:[%s5983_s7 + $0x30] sm:$0xff]  ;;  %v3826_v52 = vld [vmem:[%s5983_s7 + $0x38] sm:$0xff] }
  0x17   :  { %v3835_v55 = vld [vmem:[%s5985_s9 + $0x20] sm:$0xff]  ;;  %v3848_v63 = vld [vmem:[%s5987_s11 + $0x28] sm:$0xff]  ;;  %v3849_v1 = vld [vmem:[%s5987_s11 + $0x30] sm:$0xff]  ;;  %p5053_p3 = por %p5052_p2, %p5051_p1 }
  0x18   :  { %4654 = vmatpush3.bf16.msra.mxu1 %v5199_v11  ;;  %4682 = vmatpush3.bf16.msra.mxu0 %v4679_v39  ;;  %v5415_v5 = vld [vmem:[%s5981_s5 + $0x8] sm:$0xff]  ;;  %v5420_v6 = vld [vmem:[%s5981_s5] sm:$0xff]  ;;  %vm4940_vm6 = vmpackc.low %vm173_vm3, %vm173_vm3  ;;  %s6008_s5 = sld [smem:[#allocation6_spill]] }
  0x19   :  { %4656 = vmatprep.subr.bf16.mxu1 %v5209_v14  ;;  %4692 = vmatprep.subr.bf16.mxu0 %v4691_v45  ;;  %p5054_p4 = pnand %p5053_p3, %p5047_p0 }
  0x1c   :  { %4658 = vmatpush3.bf16.msra.mxu1 %v5209_v14 }
  0x1d   :  { %4660 = vmatprep.subr.bf16.mxu1 %v4659_v31 }
  0x8b   :  { %v66_v17 = vpop.permute.xlu0 %65 }
  0x8c   :  { %vm70_vm1 = vcmp.eq.s32.totalorder %v5214_v16, %v66_v17 }
  0x8d   :  { %v72_v19 = vsel %vm70_vm1, 5.656854, %v5071_v18 }
  0x8e   :  { %4235 = vmatprep.mubr.msk.f32.mxu1 %vm82_vm0, %v72_v19 }
  0x8f   :  { %v69_v20 = vpop.permute.xlu0 %68 }
  0x90   :  { %vm71_vm2 = vcmp.eq.s32.totalorder %v5214_v16, %v69_v20 }
  0x91   :  { %v73_v21 = vsel %vm71_vm2, 5.656854, %v5071_v18 }
  0x92   :  { %4236 = vmatmul.mubr.msk.f32.vlgmr.msra.gmra.mrb[0].mxu1 %vm82_vm0, %v73_v21  ;;  %v5327_v21 = vld [vmem:[%s5979_s3 + $0x8] sm:$0xff] }
  0x93   :  { %4662 = vmatpush3.bf16.msra.mxu1 %v4659_v31 }
  0x94   :  { %4664 = vmatprep.subr.bf16.mxu1 %v4663_v37 }
  0x97   :  { %4666 = vmatpush3.bf16.msra.mxu1 %v4663_v37 }
  0x98   :  { %4668 = vmatprep.subr.bf16.mxu1 %v4667_v43 }
 0x165   :  { %v5222_v22 = vpop.f32.mrb[0].mxu1 }
 0x166   :  { %v5224_v23 = vpop.f32.mrb[1].mxu1  ;;  %v172_v26 = vmul.f32 %v5222_v22, %v5222_v22 }
 0x167   :  { %v171_v24 = vmul.f32 %v5224_v23, %v5224_v23 }
 0x168   :  { %v177_v27 = vsel %vm173_vm3, %v172_v26, 0.0  ;;  %v5342_v26 = vld [vmem:[%s5980_s4] sm:$0xff] }
 0x169   :  { %v174_v25 = vsel %vm173_vm3, %v171_v24, 0.0  ;;  %v5332_v24 = vld [vmem:[%s5980_s4 + $0x8] sm:$0xff] }
 0x16a   :  { %175 = vadd.xlane.f32.xlu1 %v174_v25  ;;  %v5337_v25 = vld [vmem:[%s5979_s3] sm:$0xff] }
 0x16e   :  { %178 = vadd.xlane.f32.xlu1 %v177_v27 }
 0x1f7   :  { %v176_v46 = vpop.xlane.xlu1 %175 }
 0x1f8   :  { %v181_v47 = vmul.f32 0.03125, %v176_v46  ;;  %v3824_v46 = vld [vmem:[%s5983_s7 + $0x28] sm:$0xff] }
 0x1fa   :  { %v183_v48 = vadd.f32 1e-06, %v181_v47 }
 0x1fb   :  { %v179_v49 = vpop.xlane.xlu1 %178 }
 0x1fc   :  { %4972 = vrsqrt.f32 %v183_v48  ;;  %v182_v50 = vmul.f32 0.03125, %v179_v49 }
 0x1fe   :  { %v184_v53 = vadd.f32 1e-06, %v182_v50 }
 0x200   :  { %4974 = vrsqrt.f32 %v184_v53  ;;  %v4713_v53 = vpack.c.bf16 %v3826_v52, %v3825_v51  ;;  %v3832_v51 = vld [vmem:[%s5984_s8 + $0x38] sm:$0xff] }
 0x206   :  { %v4973_v57 = vpop.eup %4972 }
 0x207   :  { %v187_v58 = vmul.f32 %v4973_v57, %v5224_v23 }
 0x209   :  { %v5275_v59 = vmul.f32 %v194_v56, %v187_v58  ;;  %v3837_v58 = vld [vmem:[%s5985_s9 + $0x30] sm:$0xff] }
 0x20a   :  { %v4975_v60 = vpop.eup %4974 }
 0x20b   :  { %v188_v62 = vmul.f32 %v4975_v60, %v5222_v22  ;;  %4246 = vmatprep.mubr.msk.f32.mxu1 %vm173_vm3, %v5275_v59  ;;  %4268 = vmatprep.mubr.msk.f32.mxu0 %vm173_vm3, %v5275_v59  ;;  %v3838_v60 = vld [vmem:[%s5985_s9 + $0x38] sm:$0xff] }
 0x20c   :  { %v4729_v61 = vpack.c.bf16 %v3838_v60, %v3837_v58  ;;  %v3843_v60 = vld [vmem:[%s5986_s10 + $0x30] sm:$0xff] }
 0x20d   :  { %v5294_v2 = vmul.f32 %v194_v56, %v188_v62  ;;  %v3836_v56 = vld [vmem:[%s5985_s9 + $0x28] sm:$0xff]  ;;  %v3847_v62 = vld [vmem:[%s5987_s11 + $0x20] sm:$0xff] }
 0x20e   :  { %v4725_v57 = vpack.c.bf16 %v3836_v56, %v3835_v55  ;;  %v4741_v0 = vpack.c.bf16 %v3848_v63, %v3847_v62  ;;  %v3841_v56 = vld [vmem:[%s5986_s10 + $0x20] sm:$0xff] }
 0x20f   :  { %4247 = vmatmul.mubr.msk.f32.vlgmr.msra.gmra.mrb[2].mxu1 %vm173_vm3, %v5294_v2  ;;  %4269 = vmatmul.mubr.msk.f32.vlgmr.msra.gmra.mrb[0].mxu0 %vm173_vm3, %v5294_v2 }
 0x210   :  { %4670 = vmatpush3.bf16.msra.mxu1 %v4667_v43  ;;  %4694 = vmatpush3.bf16.msra.mxu0 %v4691_v45  ;;  %v3823_v45 = vld [vmem:[%s5983_s7 + $0x20] sm:$0xff] }
 0x211   :  { %4257 = vmatprep.mubr.msk.f32.mxu1 %vm173_vm3, %v5275_v59  ;;  %4290 = vmatprep.mubr.msk.f32.mxu0 %vm173_vm3, %v5275_v59  ;;  %v4709_v50 = vpack.c.bf16 %v3824_v46, %v3823_v45 }
 0x212   :  { %4672 = vmatprep.subr.bf16.mxu1 %v4671_v3  ;;  %4696 = vmatprep.subr.bf16.mxu0 %v4695_v4 }
 0x214   :  { %4674 = vmatpush3.bf16.msra.mxu1 %v4671_v3  ;;  %4698 = vmatpush3.bf16.msra.mxu0 %v4695_v4  ;;  %v3850_v3 = vld [vmem:[%s5987_s11 + $0x38] sm:$0xff] }
 0x215   :  { %4684 = vmatprep.subr.bf16.mxu1 %v4683_v9  ;;  %v4745_v4 = vpack.c.bf16 %v3850_v3, %v3849_v1 }
 0x217   :  { %4258 = vmatmul.mubr.msk.f32.vlgmr.msra.gmra.mrb[4].mxu1 %vm173_vm3, %v5294_v2  ;;  %4291 = vmatmul.mubr.msk.f32.vlgmr.msra.gmra.mrb[2].mxu0 %vm173_vm3, %v5294_v2 }
 0x218   :  { %4686 = vmatpush3.bf16.msra.mxu1 %v4683_v9  ;;  %4279 = vmatprep.mubr.msk.f32.mxu1 %vm173_vm3, %v5275_v59 }
 0x219   :  { %4688 = vmatprep.subr.bf16.mxu1 %v4687_v13 }
 0x21c   :  { %4690 = vmatpush3.bf16.msra.mxu1 %v4687_v13 }
 0x21f   :  { %4280 = vmatmul.mubr.msk.f32.vlgmr.msra.gmra.mrb[6].mxu1 %vm173_vm3, %v5294_v2 }
 0x2e2   :  { %v4248_v15 = vpop.f32.mrb[2].mxu1  ;;  %v4270_v17 = vpop.f32.mrb[0].mxu0 }
 0x2e3   :  { %v274_v19 = vpop.f32.mrb[3].mxu1  ;;  %v432_v20 = vpop.f32.mrb[1].mxu0  ;;  %v600_v29 = vmul.f32 %v4248_v15, %v5327_v21  ;;  %v606_v39 = vmul.f32 %v4270_v17, %v5327_v21 }
 0x2e4   :  { %v599_v33 = vmul.f32 %v274_v19, %v5337_v25  ;;  %v605_v42 = vmul.f32 %v432_v20, %v5337_v25 }
 0x2ea   :  { %v4259_v27 = vpop.f32.mrb[4].mxu1  ;;  %v4292_v28 = vpop.f32.mrb[2].mxu0 }
 0x2eb   :  { %v602_v30 = vmul.f32 %v4259_v27, %v5332_v24  ;;  %v353_v31 = vpop.f32.mrb[5].mxu1  ;;  %v590_v32 = vpop.f32.mrb[3].mxu0 }
 0x2ec   :  { %v601_v34 = vmul.f32 %v353_v31, %v5342_v26  ;;  %v4705_v35 = vpack.c.bf16 %v4292_v28, %v590_v32 }
 0x2ed   :  { %v604_v36 = vadd.f32 %v602_v30, %v600_v29 }
 0x2ee   :  { %v603_v37 = vadd.f32 %v601_v34, %v599_v33  ;;  %4706 = vmatprep.subr.bf16.mxu0 %v4705_v35 }
 0x2ef   :  { %4708 = vmatpush3.bf16.msra.mxu0 %v4705_v35 }
 0x2f0   :  { %4297 = vmatprep.mubr.msk.f32.mxu1 %vm611_vm4, %v603_v37 }
 0x2f2   :  { %v4281_v38 = vpop.f32.mrb[6].mxu1 }
 0x2f3   :  { %v608_v40 = vmul.f32 %v4281_v38, %v5332_v24  ;;  %v511_v41 = vpop.f32.mrb[7].mxu1 }
 0x2f4   :  { %v607_v43 = vmul.f32 %v511_v41, %v5342_v26 }
 0x2f5   :  { %v610_v44 = vadd.f32 %v608_v40, %v606_v39 }
 0x2f6   :  { %v609_v47 = vadd.f32 %v607_v43, %v605_v42  ;;  %v3829_v42 = vld [vmem:[%s5984_s8 + $0x20] sm:$0xff]  ;;  %v3830_v43 = vld [vmem:[%s5984_s8 + $0x28] sm:$0xff] }
 0x2f8   :  { %v4699_v49 = vpack.c.bf16 %v610_v44, %v609_v47  ;;  %v4717_v44 = vpack.c.bf16 %v3830_v43, %v3829_v42 }
 0x2fa   :  { %4701 = vmatprep.subr.msk.bf16.mxu1 %vm5361_vm5, %v4699_v49  ;;  %4718 = vmatprep.subr.bf16.mxu0 %v4717_v44 }
 0x2fb   :  { %4704 = vmatpush3.bf16.xpose.msk.msra.mxu1 %vm5361_vm5, %v4699_v49 }
 0x2fc   :  { %4710 = vmatprep.subr.bf16.mxu1 %v4709_v50 }
 0x302   :  { %4298 = vmatmul.mubr.msk.f32.vlgmr.msra.gmra.mrb[8].mxu1 %vm611_vm4, %v604_v36 }
 0x303   :  { %4712 = vmatpush3.bf16.msra.mxu1 %v4709_v50  ;;  %4315 = vmatprep.mubr.msk.f32.mxu1 %vm173_vm3, %v5275_v59  ;;  %v3831_v50 = vld [vmem:[%s5984_s8 + $0x30] sm:$0xff] }
 0x304   :  { %4714 = vmatprep.subr.bf16.mxu1 %v4713_v53  ;;  %v4721_v55 = vpack.c.bf16 %v3832_v51, %v3831_v50 }
 0x307   :  { %4716 = vmatpush3.bf16.msra.mxu1 %v4713_v53 }
 0x308   :  { %4726 = vmatprep.subr.bf16.mxu1 %v4725_v57 }
 0x30a   :  { %4316 = vmatmul.mubr.msk.f32.vlgmr.msra.gmra.mrb[10].mxu1 %vm173_vm3, %v5294_v2 }
 0x30b   :  { %4728 = vmatpush3.bf16.msra.mxu1 %v4725_v57  ;;  %4337 = vmatprep.mubr.msk.f32.mxu1 %vm173_vm3, %v5275_v59  ;;  %v3842_v57 = vld [vmem:[%s5986_s10 + $0x28] sm:$0xff] }
 0x30c   :  { %4730 = vmatprep.subr.bf16.mxu1 %v4729_v61  ;;  %v4733_v58 = vpack.c.bf16 %v3842_v57, %v3841_v56 }
 0x30f   :  { %4732 = vmatpush3.bf16.msra.mxu1 %v4729_v61  ;;  %v3844_v61 = vld [vmem:[%s5986_s10 + $0x38] sm:$0xff] }
 0x310   :  { %4742 = vmatprep.subr.bf16.mxu1 %v4741_v0  ;;  %v4737_v62 = vpack.c.bf16 %v3844_v61, %v3843_v60  ;;  %v803_v60 = vld [vmem:[%s5988_s12 + $0x8] sm:$0xff] }
 0x312   :  { %4338 = vmatmul.mubr.msk.f32.vlgmr.msra.gmra.mrb[12].mxu1 %vm173_vm3, %v5294_v2 }
 0x313   :  { %4744 = vmatpush3.bf16.msra.mxu1 %v4741_v0  ;;  %4359 = vmatprep.mubr.msk.f32.mxu1 %vm173_vm3, %v5275_v59 }
 0x314   :  { %4746 = vmatprep.subr.bf16.mxu1 %v4745_v4 }
 0x317   :  { %4748 = vmatpush3.bf16.msra.mxu1 %v4745_v4 }
 0x31a   :  { %4360 = vmatmul.mubr.msk.f32.vlgmr.msra.gmra.mrb[14].mxu1 %vm173_vm3, %v5294_v2 }
 0x3d5   :  { %v4299_v9 = vpop.f32.mrb[8].mxu1 }
 0x3d6   :  { %v696_v10 = vadd.f32 %v4299_v9, %v5415_v5  ;;  %v690_v12 = vpop.f32.mrb[9].mxu1 }
 0x3d7   :  { %v691_v13 = vadd.f32 %v690_v12, %v5420_v6 }
 0x3d8   :  { %v702_v15 = vsel %vm611_vm4, %v696_v10, -inf }
 0x3d9   :  { %703 = vmax.xlane.f32.xlu1 %v702_v15  ;;  %v699_v17 = vsel %vm611_vm4, %v691_v13, -inf }
 0x3da   :  { %700 = vmax.xlane.f32.xlu0 %v699_v17 }
 0x3dd   :  { %v4317_v19 = vpop.f32.mrb[10].mxu1 }
 0x3de   :  { %v875_v20 = vpop.f32.mrb[11].mxu1  ;;  %v1205_v3 = vmul.f32 %v4317_v19, %v5327_v21 }
 0x3e5   :  { %v5426_v27 = vpop.f32.mrb[12].mxu1 }
 0x3e6   :  { %v5428_v28 = vpop.f32.mrb[13].mxu1 }
 0x3e7   :  { %v1210_v19 = vmul.f32 %v5428_v28, %v5337_v25 }
 0x3ed   :  { %v4361_v29 = vpop.f32.mrb[14].mxu1 }
 0x3ee   :  { %v1195_v30 = vpop.f32.mrb[15].mxu1 }
 0x3ef   :  { %v5430_v31 = vpack.c.bf16 %v4361_v29, %v1195_v30 }
 0x466   :  { %v704_v32 = vpop.xlane.xlu1 %703 }
 0x467   :  { %v706_v33 = vsub.f32 %v696_v10, %v704_v32  ;;  %v701_v34 = vpop.xlane.xlu0 %700  ;;  %v1204_v10 = vmul.f32 %v875_v20, %v5337_v25 }
 0x468   :  { %v705_v35 = vsub.f32 %v691_v13, %v701_v34 }
 0x469   :  { %v709_v36 = vmul.f32 1.442695, %v706_v33 }
 0x46a   :  { %v707_v37 = vmul.f32 1.442695, %v705_v35 }
 0x46c   :  { %4976 = vpow2.f32 %v707_v37 }
 0x46d   :  { %4978 = vpow2.f32 %v709_v36 }
 0x476   :  { %v4977_v38 = vpop.eup %4976 }
 0x477   :  { %v711_v39 = vsel %vm611_vm4, %v4977_v38, 0.0  ;;  %v4979_v40 = vpop.eup %4978 }
 0x478   :  { %712 = vadd.xlane.f32.xlu1 %v711_v39  ;;  %v714_v41 = vsel %vm611_vm4, %v4979_v40, 0.0 }
 0x47c   :  { %715 = vadd.xlane.f32.xlu1 %v714_v41 }
 0x505   :  { %v713_v45 = vpop.xlane.xlu1 %712 }
 0x506   :  { %4980 = vrcp.f32 %v713_v45 }
 0x509   :  { %v716_v46 = vpop.xlane.xlu1 %715 }
 0x50a   :  { %4982 = vrcp.f32 %v716_v46 }
 0x510   :  { %v4981_v47 = vpop.eup %4980 }
 0x511   :  { %v719_v49 = vmul.f32 %v4981_v47, %v4977_v38  ;;  %v3859_v47 = vld [vmem:[%s5988_s12 + $0x10] sm:$0xff] }
 0x513   :  { %4304 = vmatprep.mubr.msk.f32.mxu0 %vm611_vm4, %v719_v49  ;;  %v3860_v49 = vld [vmem:[%s5988_s12 + $0x18] sm:$0xff] }
 0x514   :  { %v4983_v52 = vpop.eup %4982  ;;  %v4759_v50 = vpack.c.bf16 %v3860_v49, %v3859_v47  ;;  %v1784_v47 = vld [vmem:[%s5992_s16 + $0x8] sm:$0xff] }
 0x515   :  { %v720_v53 = vmul.f32 %v4983_v52, %v4979_v40 }
 0x517   :  { %4305 = vmatmul.mubr.msk.f32.vlgmr.msra.gmra.mrb[4].mxu0 %vm611_vm4, %v720_v53 }
 0x518   :  { %4720 = vmatpush3.bf16.msra.mxu0 %v4717_v44  ;;  %4326 = vmatprep.mubr.msk.f32.mxu0 %vm173_vm3, %v5275_v59 }
 0x519   :  { %4722 = vmatprep.subr.bf16.mxu0 %v4721_v55 }
 0x51c   :  { %4724 = vmatpush3.bf16.msra.mxu0 %v4721_v55 }
 0x51d   :  { %4734 = vmatprep.subr.bf16.mxu0 %v4733_v58 }
 0x51f   :  { %4327 = vmatmul.mubr.msk.f32.vlgmr.msra.gmra.mrb[6].mxu0 %vm173_vm3, %v5294_v2 }
 0x520   :  { %4736 = vmatpush3.bf16.msra.mxu0 %v4733_v58  ;;  %4348 = vmatprep.mubr.msk.f32.mxu0 %vm173_vm3, %v5275_v59  ;;  %v802_v58 = vld [vmem:[%s5988_s12] sm:$0xff] }
 0x521   :  { %4738 = vmatprep.subr.bf16.mxu0 %v4737_v62  ;;  %v4763_v61 = vpack.c.bf16 %v803_v60, %v802_v58  ;;  %v1790_v58 = vld [vmem:[%s5992_s16 + $0x38] sm:$0xff] }
 0x524   :  { %4740 = vmatpush3.bf16.msra.mxu0 %v4737_v62 }
 0x527   :  { %4349 = vmatmul.mubr.msk.f32.vlgmr.msra.gmra.mrb[8].mxu0 %vm173_vm3, %v5294_v2  ;;  %v1211_v2 = vmul.f32 %v5426_v27, %v5327_v21 }
 0x5ea   :  { %v5468_v63 = vpop.f32.mrb[4].mxu0 }
 0x5eb   :  { %v5470_v0 = vpop.f32.mrb[5].mxu0 }
 0x5f2   :  { %v4328_v1 = vpop.f32.mrb[6].mxu0 }
 0x5f3   :  { %v1207_v4 = vmul.f32 %v4328_v1, %v5332_v24  ;;  %v955_v9 = vpop.f32.mrb[7].mxu0 }
 0x5f4   :  { %v1206_v12 = vmul.f32 %v955_v9, %v5342_v26 }
 0x5f5   :  { %v1209_v59 = vadd.f32 %v1207_v4, %v1205_v3 }
 0x5f6   :  { %v1208_v13 = vadd.f32 %v1206_v12, %v1204_v10 }
 0x5f8   :  { %4366 = vmatprep.mubr.msk.f32.mxu0 %vm611_vm4, %v1208_v13 }
 0x5fa   :  { %v4350_v15 = vpop.f32.mrb[8].mxu0 }
 0x5fb   :  { %v1213_v17 = vmul.f32 %v4350_v15, %v5332_v24  ;;  %v1115_v29 = vpop.f32.mrb[9].mxu0 }
 0x5fc   :  { %v1212_v30 = vmul.f32 %v1115_v29, %v5342_v26  ;;  %v1601_v29 = vld [vmem:[%s5990_s14 + $0x10] sm:$0xff] }
 0x5fd   :  { %v1215_v32 = vadd.f32 %v1213_v17, %v1211_v2  ;;  %v1685_v2 = vld [vmem:[%s5991_s15 + $0x8] sm:$0xff] }
 0x5fe   :  { %v1214_v20 = vadd.f32 %v1212_v30, %v1210_v19  ;;  %v1602_v19 = vld [vmem:[%s5990_s14 + $0x18] sm:$0xff]  ;;  %v1686_v30 = vld [vmem:[%s5991_s15 + $0x10] sm:$0xff] }
 0x600   :  { %v4749_v33 = vpack.c.bf16 %v1215_v32, %v1214_v20  ;;  %v4771_v32 = vpack.c.bf16 %v1602_v19, %v1601_v29  ;;  %v1687_v20 = vld [vmem:[%s5991_s15 + $0x18] sm:$0xff] }
 0x602   :  { %4751 = vmatprep.subr.msk.bf16.mxu0 %vm5361_vm5, %v4749_v33 }
 0x603   :  { %4754 = vmatpush3.bf16.xpose.msk.msra.mxu0 %vm5361_vm5, %v4749_v33  ;;  %v4779_v33 = vpack.c.bf16 %v1687_v20, %v1686_v30 }
 0x604   :  { %4756 = vmatprep.subr.bf16.mxu0 %v5430_v31 }
 0x60a   :  { %4367 = vmatmul.mubr.msk.f32.vlgmr.msra.gmra.mrb[10].mxu0 %vm611_vm4, %v1209_v59 }
 0x60b   :  { %4758 = vmatpush3.bf16.msra.mxu0 %v5430_v31 }
 0x60c   :  { %4760 = vmatprep.subr.bf16.mxu0 %v4759_v50 }
 0x6dd   :  { %v4368_v27 = vpop.f32.mrb[10].mxu0 }
 0x6de   :  { %v1294_v34 = vpop.f32.mrb[11].mxu0  ;;  %v1300_v35 = vadd.f32 %v4368_v27, %v5415_v5 }
 0x6df   :  { %v1295_v28 = vadd.f32 %v1294_v34, %v5420_v6 }
 0x6e0   :  { %v1306_v37 = vsel %vm611_vm4, %v1300_v35, -inf }
 0x6e1   :  { %v1303_v36 = vsel %vm611_vm4, %v1295_v28, -inf }
 0x6e2   :  { %1304 = vmax.xlane.f32.xlu1 %v1303_v36 }
 0x6e6   :  { %1307 = vmax.xlane.f32.xlu1 %v1306_v37 }
 0x76f   :  { %v1305_v38 = vpop.xlane.xlu1 %1304 }
 0x770   :  { %v1309_v39 = vsub.f32 %v1295_v28, %v1305_v38  ;;  %v1573_v38 = vld [vmem:[%s6007_s2] sm:$0x1] }
 0x772   :  { %v1311_v40 = vmul.f32 1.442695, %v1309_v39  ;;  %v1590_v39 = vadd.f32 1.0, %v1573_v38 }
 0x773   :  { %v1308_v41 = vpop.xlane.xlu1 %1307 }
 0x774   :  { %4984 = vpow2.f32 %v1311_v40  ;;  %v1310_v42 = vsub.f32 %v1300_v35, %v1308_v41  ;;  %v1595_v41 = vrot.slane %v1590_v39, %v5271_v54 }
 0x776   :  { %v1313_v43 = vmul.f32 1.442695, %v1310_v42 }
 0x778   :  { %4986 = vpow2.f32 %v1313_v43 }
 0x77e   :  { %v4985_v31 = vpop.eup %4984 }
 0x77f   :  { %v1315_v44 = vsel %vm611_vm4, %v4985_v31, 0.0 }
 0x780   :  { %1316 = vadd.xlane.f32.xlu1 %v1315_v44 }
 0x782   :  { %v4987_v45 = vpop.eup %4986 }
 0x783   :  { %v1318_v46 = vsel %vm611_vm4, %v4987_v45, 0.0 }
 0x784   :  { %1319 = vadd.xlane.f32.xlu1 %v1318_v46  ;;  %v1783_v46 = vld [vmem:[%s5992_s16] sm:$0xff] }
 0x785   :  { %v4783_v49 = vpack.c.bf16 %v1784_v47, %v1783_v46  ;;  %v3874_v46 = vld [vmem:[%s5983_s7 + $0x50] sm:$0xff]  ;;  %v3875_v47 = vld [vmem:[%s5983_s7 + $0x58] sm:$0xff] }
 0x80d   :  { %v1317_v51 = vpop.xlane.xlu1 %1316 }
 0x80e   :  { %4988 = vrcp.f32 %v1317_v51  ;;  %v1786_v51 = vld [vmem:[%s5992_s16 + $0x18] sm:$0xff] }
 0x811   :  { %v1320_v52 = vpop.xlane.xlu1 %1319 }
 0x812   :  { %4990 = vrcp.f32 %v1320_v52 }
 0x818   :  { %v4989_v53 = vpop.eup %4988 }
 0x819   :  { %v1323_v55 = vmul.f32 %v4989_v53, %v4985_v31  ;;  %v1787_v53 = vld [vmem:[%s5992_s16 + $0x20] sm:$0xff] }
 0x81b   :  { %4373 = vmatprep.mubr.msk.f32.mxu0 %vm611_vm4, %v1323_v55  ;;  %v1788_v55 = vld [vmem:[%s5992_s16 + $0x28] sm:$0xff] }
 0x81c   :  { %v4991_v56 = vpop.eup %4990 }
 0x81d   :  { %v1324_v57 = vmul.f32 %v4991_v56, %v4987_v45  ;;  %v4791_v56 = vpack.c.bf16 %v1788_v55, %v1787_v53  ;;  %v3878_v53 = vld [vmem:[%s5984_s8 + $0x40] sm:$0xff]  ;;  %v3879_v55 = vld [vmem:[%s5984_s8 + $0x48] sm:$0xff] }
 0x81f   :  { %4374 = vmatmul.mubr.msk.f32.vlgmr.msra.gmra.mrb[12].mxu0 %vm611_vm4, %v1324_v57  ;;  %v1789_v57 = vld [vmem:[%s5992_s16 + $0x30] sm:$0xff] }
 0x820   :  { %4762 = vmatpush3.bf16.msra.mxu0 %v4759_v50  ;;  %v1785_v50 = vld [vmem:[%s5992_s16 + $0x10] sm:$0xff]  ;;  %v4795_v60 = vpack.c.bf16 %v1790_v58, %v1789_v57  ;;  %v4807_v57 = vpack.c.bf16 %v3879_v55, %v3878_v53  ;;  %v3897_v58 = vld [vmem:[%s5987_s11 + $0x48] sm:$0xff] }
 0x821   :  { %4764 = vmatprep.subr.bf16.mxu0 %v4763_v61  ;;  %v4787_v52 = vpack.c.bf16 %v1786_v51, %v1785_v50  ;;  %v4803_v50 = vpack.c.bf16 %v3875_v47, %v3874_v46  ;;  %v3887_v51 = vld [vmem:[%s5985_s9 + $0x58] sm:$0xff] }
 0x8f2   :  { %v4375_v62 = vpop.f32.mrb[12].mxu0 }
 0x8f3   :  { %v1397_v1 = vpop.f32.mrb[13].mxu0 }
 0x8f4   :  { %4380 = vmatprep.mubr.msk.f32.mxu0 %vm611_vm4, %v1397_v1 }
 0x8f5   :  { %4381 = vmatmul.mubr.msk.f32.vlgmr.msra.gmra.mrb[14].mxu0 %vm611_vm4, %v4375_v62 }
 0x8f6   :  { %4766 = vmatpush3.bf16.msra.mxu0 %v4763_v61  ;;  %4387 = vmatprep.mubr.msk.f32.mxu0 %vm611_vm4, %v5470_v0 }
 0x8fd   :  { %4388 = vmatmul.mubr.msk.f32.vlgmr.msra.gmra.mrb[14].mxu0 %vm611_vm4, %v5468_v63  ;;  %v1684_v63 = vld [vmem:[%s5991_s15] sm:$0xff] }
 0x8fe   :  { %v4775_v17 = vpack.c.bf16 %v1685_v2, %v1684_v63 }
 0x900   :  { %4776 = vmatprep.subr.bf16.mxu0 %v4775_v17 }
 0x901   :  { %4778 = vmatpush3.bf16.msra.mxu0 %v4775_v17 }
 0x902   :  { %4780 = vmatprep.subr.bf16.mxu0 %v4779_v33 }
 0x905   :  { %4782 = vmatpush3.bf16.msra.mxu0 %v4779_v33 }
 0x9d0   :  { %v4389_v3 = vpop.f32.mrb[14].mxu0 }
 0x9d1   :  { %v5517_v4 = vadd.f32 %v4389_v3, %v5222_v22  ;;  %v1562_v9 = vpop.f32.mrb[15].mxu0  ;;  %v1599_v22 = vld [vmem:[%s5990_s14] sm:$0xff] }
 0x9d2   :  { %v5520_v10 = vadd.f32 %v1562_v9, %v5224_v23  ;;  %v1600_v23 = vld [vmem:[%s5990_s14 + $0x8] sm:$0xff] }
 0x9d3   :  { %v1575_v12 = vmul.f32 %v5517_v4, %v5517_v4  ;;  %v4767_v15 = vpack.c.bf16 %v1600_v23, %v1599_v22 }
 0x9d4   :  { %v1574_v59 = vmul.f32 %v5520_v10, %v5520_v10 }
 0x9d5   :  { %v1579_v13 = vsel %vm173_vm3, %v1575_v12, 0.0  ;;  %4768 = vmatprep.subr.bf16.mxu1 %v4767_v15 }
 0x9d6   :  { %1580 = vadd.xlane.f32.xlu0 %v1579_v13  ;;  %v1576_v0 = vsel %vm173_vm3, %v1574_v59, 0.0  ;;  %4770 = vmatpush3.bf16.msra.mxu1 %v4767_v15 }
 0x9d7   :  { %1577 = vadd.xlane.f32.xlu1 %v1576_v0  ;;  %4772 = vmatprep.subr.bf16.mxu1 %v4771_v32 }
 0x9da   :  { %4774 = vmatpush3.bf16.msra.mxu1 %v4771_v32 }
 0x9db   :  { %4784 = vmatprep.subr.bf16.mxu1 %v4783_v49 }
 0xa63   :  { %v1581_v27 = vpop.xlane.xlu0 %1580 }
 0xa64   :  { %v1583_v34 = vmul.f32 0.03125, %v1581_v27  ;;  %v1578_v28 = vpop.xlane.xlu1 %1577 }
 0xa65   :  { %v1582_v35 = vmul.f32 0.03125, %v1578_v28 }
 0xa66   :  { %v1585_v36 = vadd.f32 1e-06, %v1583_v34 }
 0xa67   :  { %v1584_v37 = vadd.f32 1e-06, %v1582_v35 }
 0xa68   :  { %4992 = vrsqrt.f32 %v1585_v36 }
 0xa69   :  { %4994 = vrsqrt.f32 %v1584_v37 }
 0xa72   :  { %v4993_v40 = vpop.eup %4992 }
 0xa73   :  { %v4995_v42 = vpop.eup %4994  ;;  %v1589_v43 = vmul.f32 %v4993_v40, %v5517_v4 }
 0xa74   :  { %v1588_v31 = vmul.f32 %v4995_v42, %v5520_v10 }
 0xa75   :  { %v1598_v45 = vmul.f32 %v1595_v41, %v1589_v43  ;;  %v3884_v43 = vld [vmem:[%s5985_s9 + $0x40] sm:$0xff] }
 0xa76   :  { %v1597_v44 = vmul.f32 %v1595_v41, %v1588_v31 }
 0xa78   :  { %4398 = vmatprep.mubr.msk.f32.mxu1 %vm173_vm3, %v1597_v44  ;;  %4409 = vmatprep.mubr.msk.f32.mxu0 %vm173_vm3, %v1597_v44  ;;  %v3885_v44 = vld [vmem:[%s5985_s9 + $0x48] sm:$0xff] }
 0xa79   :  { %4399 = vmatmul.mubr.msk.f32.vlgmr.msra.gmra.mrb[16].mxu1 %vm173_vm3, %v1598_v45  ;;  %4410 = vmatmul.mubr.msk.f32.vlgmr.msra.gmra.mrb[16].mxu0 %vm173_vm3, %v1598_v45  ;;  %v4815_v45 = vpack.c.bf16 %v3885_v44, %v3884_v43 }
 0xa7a   :  { %4786 = vmatpush3.bf16.msra.mxu1 %v4783_v49  ;;  %v3886_v49 = vld [vmem:[%s5985_s9 + $0x50] sm:$0xff] }
 0xa7b   :  { %4788 = vmatprep.subr.bf16.mxu1 %v4787_v52 }
 0xa7e   :  { %4790 = vmatpush3.bf16.msra.mxu1 %v4787_v52  ;;  %v4819_v52 = vpack.c.bf16 %v3887_v51, %v3886_v49 }
 0xa7f   :  { %4792 = vmatprep.subr.bf16.mxu1 %v4791_v56 }
 0xa82   :  { %4794 = vmatpush3.bf16.msra.mxu1 %v4791_v56  ;;  %v3896_v56 = vld [vmem:[%s5987_s11 + $0x40] sm:$0xff] }
 0xa83   :  { %4796 = vmatprep.subr.bf16.mxu1 %v4795_v60 }
 0xa86   :  { %4798 = vmatpush3.bf16.msra.mxu1 %v4795_v60  ;;  %v4831_v60 = vpack.c.bf16 %v3897_v58, %v3896_v56 }
 0xa87   :  { %4816 = vmatprep.subr.bf16.mxu1 %v4815_v45 }
 0xb4c   :  { %v4400_v61 = vpop.f32.mrb[16].mxu1  ;;  %v4411_v62 = vpop.f32.mrb[16].mxu0 }
 0xb4d   :  { %v1766_v1 = vmul.f32 0.044715, %v4400_v61  ;;  %v1675_v3 = vpop.f32.mrb[17].mxu1  ;;  %v1754_v9 = vpop.f32.mrb[17].mxu0  ;;  %v1764_v19 = vmul.f32 0.5, %v4400_v61 }
 0xb4e   :  { %v1765_v12 = vmul.f32 0.044715, %v1675_v3  ;;  %v1763_v32 = vmul.f32 0.5, %v1675_v3 }
 0xb4f   :  { %v1768_v59 = vmul.f32 %v4400_v61, %v1766_v1 }
 0xb50   :  { %v1767_v13 = vmul.f32 %v1765_v12, %v1675_v3 }
 0xb51   :  { %v1770_v0 = vmul.f32 %v4400_v61, %v1768_v59  ;;  %v3871_v59 = vld [vmem:[%s5982_s6 + $0x1] sm:$0x1] }
 0xb52   :  { %v1769_v22 = vmul.f32 %v1767_v13, %v1675_v3  ;;  %v1892_v13 = vadd.f32 1.0, %v3871_v59  ;;  %v3929_v59 = vld [vmem:[%s5986_s10 + $0x68] sm:$0xff] }
 0xb53   :  { %v1772_v23 = vadd.f32 %v4400_v61, %v1770_v0 }
 0xb54   :  { %v1771_v63 = vadd.f32 %v1769_v22, %v1675_v3  ;;  %v1897_v22 = vrot.slane %v1892_v13, %v5271_v54 }
 0xb55   :  { %v1774_v15 = vmul.f32 0.7978846, %v1772_v23 }
 0xb56   :  { %v1773_v2 = vmul.f32 0.7978846, %v1771_v63 }
 0xb57   :  { %4996 = vtanh.f32 %v1774_v15 }
 0xb58   :  { %4998 = vtanh.f32 %v1773_v2  ;;  %v3880_v2 = vld [vmem:[%s5984_s8 + $0x50] sm:$0xff] }
 0xb61   :  { %v4997_v17 = vpop.eup %4996 }
 0xb62   :  { %v4999_v29 = vpop.eup %4998  ;;  %v1778_v30 = vadd.f32 1.0, %v4997_v17  ;;  %v3881_v17 = vld [vmem:[%s5984_s8 + $0x58] sm:$0xff] }
 0xb63   :  { %v1777_v20 = vadd.f32 1.0, %v4999_v29  ;;  %v3898_v29 = vld [vmem:[%s5987_s11 + $0x50] sm:$0xff] }
 0xb64   :  { %v1780_v33 = vmul.f32 %v1778_v30, %v1764_v19  ;;  %v3899_v19 = vld [vmem:[%s5987_s11 + $0x58] sm:$0xff] }
 0xb65   :  { %v1779_v27 = vmul.f32 %v1777_v20, %v1763_v32  ;;  %v4811_v20 = vpack.c.bf16 %v3881_v17, %v3880_v2 }
 0xb66   :  { %v1782_v34 = vmul.f32 %v4411_v62, %v1780_v33  ;;  %v4835_v33 = vpack.c.bf16 %v3899_v19, %v3898_v29 }
 0xb67   :  { %v1781_v28 = vmul.f32 %v1779_v27, %v1754_v9  ;;  %v3890_v27 = vld [vmem:[%s5986_s10 + $0x40] sm:$0xff] }
 0xb69   :  { %4428 = vmatprep.mubr.msk.f32.mxu1 %vm82_vm0, %v1781_v28 }
 0xb6a   :  { %4429 = vmatmul.mubr.msk.f32.vlgmr.msra.gmra.mrb[18].mxu1 %vm82_vm0, %v1782_v34  ;;  %v3891_v34 = vld [vmem:[%s5986_s10 + $0x48] sm:$0xff] }
 0xb6b   :  { %4818 = vmatpush3.bf16.msra.mxu1 %v4815_v45  ;;  %v4823_v28 = vpack.c.bf16 %v3891_v34, %v3890_v27 }
 0xb6c   :  { %4820 = vmatprep.subr.bf16.mxu1 %v4819_v52 }
 0xb6f   :  { %4822 = vmatpush3.bf16.msra.mxu1 %v4819_v52 }
 0xb70   :  { %4832 = vmatprep.subr.bf16.mxu1 %v4831_v60 }
 0xc3d   :  { %v4430_v35 = vpop.f32.mrb[18].mxu1 }
 0xc3e   :  { %v5589_v36 = vadd.f32 %v4430_v35, %v5517_v4  ;;  %v1863_v37 = vpop.f32.mrb[19].mxu1  ;;  %v3872_v4 = vld [vmem:[%s5983_s7 + $0x40] sm:$0xff]  ;;  %v3892_v35 = vld [vmem:[%s5986_s10 + $0x50] sm:$0xff] }
 0xc3f   :  { %v5592_v38 = vadd.f32 %v1863_v37, %v5520_v10  ;;  %v3873_v10 = vld [vmem:[%s5983_s7 + $0x48] sm:$0xff]  ;;  %v3893_v37 = vld [vmem:[%s5986_s10 + $0x58] sm:$0xff] }
 0xc40   :  { %v1877_v39 = vmul.f32 %v5589_v36, %v5589_v36  ;;  %v4799_v31 = vpack.c.bf16 %v3873_v10, %v3872_v4 }
 0xc41   :  { %v1876_v40 = vmul.f32 %v5592_v38, %v5592_v38 }
 0xc42   :  { %v1881_v41 = vsel %vm173_vm3, %v1877_v39, 0.0  ;;  %4800 = vmatprep.subr.bf16.mxu0 %v4799_v31  ;;  %v4827_v39 = vpack.c.bf16 %v3893_v37, %v3892_v35 }
 0xc43   :  { %1882 = vadd.xlane.f32.xlu0 %v1881_v41  ;;  %v1878_v42 = vsel %vm173_vm3, %v1876_v40, 0.0  ;;  %4802 = vmatpush3.bf16.msra.mxu0 %v4799_v31 }
 0xc44   :  { %1879 = vadd.xlane.f32.xlu1 %v1878_v42  ;;  %4804 = vmatprep.subr.bf16.mxu0 %v4803_v50 }
 0xc47   :  { %4806 = vmatpush3.bf16.msra.mxu0 %v4803_v50 }
 0xc48   :  { %4808 = vmatprep.subr.bf16.mxu0 %v4807_v57 }
 0xcd0   :  { %v1883_v61 = vpop.xlane.xlu0 %1882 }
 0xcd1   :  { %v1885_v62 = vmul.f32 0.03125, %v1883_v61  ;;  %v1880_v1 = vpop.xlane.xlu1 %1879 }
 0xcd2   :  { %v1884_v3 = vmul.f32 0.03125, %v1880_v1  ;;  %v3917_v1 = vld [vmem:[%s5984_s8 + $0x68] sm:$0xff] }
 0xcd3   :  { %v1887_v9 = vadd.f32 1e-06, %v1885_v62  ;;  %v3916_v62 = vld [vmem:[%s5984_s8 + $0x60] sm:$0xff] }
 0xcd4   :  { %v1886_v12 = vadd.f32 1e-06, %v1884_v3 }
 0xcd5   :  { %5000 = vrsqrt.f32 %v1887_v9 }
 0xcd6   :  { %5002 = vrsqrt.f32 %v1886_v12  ;;  %v4857_v12 = vpack.c.bf16 %v3917_v1, %v3916_v62  ;;  %v3925_v62 = vld [vmem:[%s5985_s9 + $0x78] sm:$0xff] }
 0xcdf   :  { %v5001_v0 = vpop.eup %5000 }
 0xce0   :  { %v5003_v23 = vpop.eup %5002  ;;  %v1891_v63 = vmul.f32 %v5001_v0, %v5589_v36  ;;  %v3930_v0 = vld [vmem:[%s5986_s10 + $0x70] sm:$0xff] }
 0xce1   :  { %v1890_v15 = vmul.f32 %v5003_v23, %v5592_v38 }
 0xce2   :  { %v5656_v32 = vmul.f32 %v1897_v22, %v1891_v63 }
 0xce3   :  { %v5654_v30 = vmul.f32 %v1897_v22, %v1890_v15  ;;  %v3931_v22 = vld [vmem:[%s5986_s10 + $0x78] sm:$0xff] }
 0xce4   :  { %v4877_v23 = vpack.c.bf16 %v3931_v22, %v3930_v0  ;;  %v5042_v0 = vld [vmem:[%s5980_s4 + $0x8] sm:$0xff] }
 0xce5   :  { %4439 = vmatprep.mubr.msk.f32.mxu0 %vm173_vm3, %v5654_v30  ;;  %4461 = vmatprep.mubr.msk.f32.mxu1 %vm173_vm3, %v5654_v30 }
 0xce6   :  { %4440 = vmatmul.mubr.msk.f32.vlgmr.msra.gmra.mrb[18].mxu0 %vm173_vm3, %v5656_v32  ;;  %4462 = vmatmul.mubr.msk.f32.vlgmr.msra.gmra.mrb[20].mxu1 %vm173_vm3, %v5656_v32 }
 0xce7   :  { %4810 = vmatpush3.bf16.msra.mxu0 %v4807_v57  ;;  %4834 = vmatpush3.bf16.msra.mxu1 %v4831_v60 }
 0xce8   :  { %4450 = vmatprep.mubr.msk.f32.mxu0 %vm173_vm3, %v5654_v30  ;;  %4483 = vmatprep.mubr.msk.f32.mxu1 %vm173_vm3, %v5654_v30 }
 0xce9   :  { %4812 = vmatprep.subr.bf16.mxu0 %v4811_v20  ;;  %4836 = vmatprep.subr.bf16.mxu1 %v4835_v33 }
 0xceb   :  { %4814 = vmatpush3.bf16.msra.mxu0 %v4811_v20  ;;  %4838 = vmatpush3.bf16.msra.mxu1 %v4835_v33 }
 0xcec   :  { %4824 = vmatprep.subr.bf16.mxu0 %v4823_v28 }
 0xcee   :  { %4451 = vmatmul.mubr.msk.f32.vlgmr.msra.gmra.mrb[20].mxu0 %vm173_vm3, %v5656_v32  ;;  %4484 = vmatmul.mubr.msk.f32.vlgmr.msra.gmra.mrb[22].mxu1 %vm173_vm3, %v5656_v32 }
 0xcef   :  { %4826 = vmatpush3.bf16.msra.mxu0 %v4823_v28  ;;  %4472 = vmatprep.mubr.msk.f32.mxu0 %vm173_vm3, %v5654_v30 }
 0xcf0   :  { %4828 = vmatprep.subr.bf16.mxu0 %v4827_v39 }
 0xcf3   :  { %4830 = vmatpush3.bf16.msra.mxu0 %v4827_v39 }
 0xcf6   :  { %4473 = vmatmul.mubr.msk.f32.vlgmr.msra.gmra.mrb[22].mxu0 %vm173_vm3, %v5656_v32 }
 0xdb9   :  { %v4441_v40 = vpop.f32.mrb[18].mxu0  ;;  %v4463_v41 = vpop.f32.mrb[20].mxu1 }
 0xdba   :  { %v1978_v42 = vpop.f32.mrb[19].mxu0  ;;  %v2138_v4 = vpop.f32.mrb[21].mxu1  ;;  %v2308_v31 = vmul.f32 %v4441_v40, %v5327_v21  ;;  %v2314_v55 = vmul.f32 %v4463_v41, %v5327_v21  ;;  %v3918_v21 = vld [vmem:[%s5984_s8 + $0x70] sm:$0xff] }
 0xdbb   :  { %v2307_v47 = vmul.f32 %v1978_v42, %v5337_v25  ;;  %v2313_v58 = vmul.f32 %v2138_v4, %v5337_v25 }
 0xdc1   :  { %v4452_v10 = vpop.f32.mrb[20].mxu0  ;;  %v4485_v43 = vpop.f32.mrb[22].mxu1 }
 0xdc2   :  { %v2310_v44 = vmul.f32 %v4452_v10, %v5332_v24  ;;  %v2058_v45 = vpop.f32.mrb[21].mxu0  ;;  %v2298_v46 = vpop.f32.mrb[23].mxu1 }
 0xdc3   :  { %v2309_v49 = vmul.f32 %v2058_v45, %v5342_v26  ;;  %v4845_v50 = vpack.c.bf16 %v4485_v43, %v2298_v46 }
 0xdc4   :  { %v2312_v51 = vadd.f32 %v2310_v44, %v2308_v31  ;;  %v3910_v31 = vld [vmem:[%s5983_s7 + $0x60] sm:$0xff]  ;;  %v3911_v44 = vld [vmem:[%s5983_s7 + $0x68] sm:$0xff] }
 0xdc5   :  { %v2311_v52 = vadd.f32 %v2309_v49, %v2307_v47  ;;  %4846 = vmatprep.subr.bf16.mxu1 %v4845_v50  ;;  %v4849_v45 = vpack.c.bf16 %v3911_v44, %v3910_v31 }
 0xdc6   :  { %4848 = vmatpush3.bf16.msra.mxu1 %v4845_v50  ;;  %v3912_v50 = vld [vmem:[%s5983_s7 + $0x70] sm:$0xff] }
 0xdc7   :  { %4490 = vmatprep.mubr.msk.f32.mxu0 %vm611_vm4, %v2311_v52  ;;  %4850 = vmatprep.subr.bf16.mxu1 %v4849_v45 }
 0xdc9   :  { %v4474_v53 = vpop.f32.mrb[22].mxu0 }
 0xdca   :  { %v2316_v56 = vmul.f32 %v4474_v53, %v5332_v24  ;;  %v2218_v57 = vpop.f32.mrb[23].mxu0  ;;  %v3919_v24 = vld [vmem:[%s5984_s8 + $0x78] sm:$0xff] }
 0xdcb   :  { %v2315_v60 = vmul.f32 %v2218_v57, %v5342_v26  ;;  %v4861_v25 = vpack.c.bf16 %v3919_v24, %v3918_v21  ;;  %v3928_v26 = vld [vmem:[%s5986_s10 + $0x60] sm:$0xff]  ;;  %v3936_v21 = vld [vmem:[%s5987_s11 + $0x70] sm:$0xff]  ;;  %v3937_v24 = vld [vmem:[%s5987_s11 + $0x78] sm:$0xff] }
 0xdcc   :  { %v2318_v61 = vadd.f32 %v2316_v56, %v2314_v55  ;;  %v4873_v13 = vpack.c.bf16 %v3929_v59, %v3928_v26  ;;  %v3922_v57 = vld [vmem:[%s5985_s9 + $0x60] sm:$0xff] }
 0xdcd   :  { %v2317_v3 = vadd.f32 %v2315_v60, %v2313_v58  ;;  %v3923_v58 = vld [vmem:[%s5985_s9 + $0x68] sm:$0xff] }
 0xdce   :  { %v4865_v60 = vpack.c.bf16 %v3923_v58, %v3922_v57  ;;  %v3947_v57 = vld [vmem:[%s5988_s12 + $0x38] sm:$0xff] }
 0xdcf   :  { %v4839_v9 = vpack.c.bf16 %v2318_v61, %v2317_v3  ;;  %v3924_v61 = vld [vmem:[%s5985_s9 + $0x70] sm:$0xff]  ;;  %v3934_v3 = vld [vmem:[%s5987_s11 + $0x60] sm:$0xff] }
 0xdd0   :  { %v4869_v1 = vpack.c.bf16 %v3925_v62, %v3924_v61 }
 0xdd1   :  { %4841 = vmatprep.subr.msk.bf16.mxu0 %vm5361_vm5, %v4839_v9 }
 0xdd2   :  { %4844 = vmatpush3.bf16.xpose.msk.msra.mxu0 %vm5361_vm5, %v4839_v9  ;;  %v3935_v9 = vld [vmem:[%s5987_s11 + $0x68] sm:$0xff] }
 0xdd3   :  { %4858 = vmatprep.subr.bf16.mxu0 %v4857_v12 }
 0xdd9   :  { %4491 = vmatmul.mubr.msk.f32.vlgmr.msra.gmra.mrb[24].mxu0 %vm611_vm4, %v2312_v51  ;;  %v3913_v51 = vld [vmem:[%s5983_s7 + $0x78] sm:$0xff] }
 0xdda   :  { %4860 = vmatpush3.bf16.msra.mxu0 %v4857_v12  ;;  %4519 = vmatprep.mubr.msk.f32.mxu0 %vm173_vm3, %v5654_v30  ;;  %v4853_v56 = vpack.c.bf16 %v3913_v51, %v3912_v50  ;;  %v4881_v12 = vpack.c.bf16 %v3935_v9, %v3934_v3 }
 0xddb   :  { %4862 = vmatprep.subr.bf16.mxu0 %v4861_v25 }
 0xdde   :  { %4864 = vmatpush3.bf16.msra.mxu0 %v4861_v25  ;;  %v4885_v25 = vpack.c.bf16 %v3937_v24, %v3936_v21  ;;  %v3909_v21 = vld [vmem:[%s5988_s12 + $0x28] sm:$0xff] }
 0xddf   :  { %4874 = vmatprep.subr.bf16.mxu0 %v4873_v13 }
 0xde1   :  { %4520 = vmatmul.mubr.msk.f32.vlgmr.msra.gmra.mrb[26].mxu0 %vm173_vm3, %v5656_v32 }
 0xde2   :  { %4876 = vmatpush3.bf16.msra.mxu0 %v4873_v13  ;;  %4541 = vmatprep.mubr.msk.f32.mxu0 %vm173_vm3, %v5654_v30 }
 0xde3   :  { %4878 = vmatprep.subr.bf16.mxu0 %v4877_v23 }
 0xde6   :  { %4880 = vmatpush3.bf16.msra.mxu0 %v4877_v23 }
 0xde9   :  { %4542 = vmatmul.mubr.msk.f32.vlgmr.msra.gmra.mrb[28].mxu0 %vm173_vm3, %v5656_v32 }
 0xeac   :  { %v4492_v63 = vpop.f32.mrb[24].mxu0 }
 0xead   :  { %v2403_v15 = vadd.f32 %v4492_v63, %v5415_v5  ;;  %v2397_v2 = vpop.f32.mrb[25].mxu0 }
 0xeae   :  { %v2398_v17 = vadd.f32 %v2397_v2, %v5420_v6  ;;  %v5045_v2 = vld [vmem:[%s5979_s3] sm:$0xff] }
 0xeaf   :  { %v2409_v29 = vsel %vm611_vm4, %v2403_v15, -inf }
 0xeb0   :  { %2410 = vmax.xlane.f32.xlu0 %v2409_v29  ;;  %v2406_v19 = vsel %vm611_vm4, %v2398_v17, -inf }
 0xeb1   :  { %2407 = vmax.xlane.f32.xlu1 %v2406_v19 }
 0xeb4   :  { %v5740_v20 = vpop.f32.mrb[26].mxu0 }
 0xeb5   :  { %v5742_v33 = vpop.f32.mrb[27].mxu0  ;;  %v2915_v22 = vmul.f32 %v5042_v0, %v5740_v20 }
 0xebc   :  { %v5744_v27 = vpop.f32.mrb[28].mxu0 }
 0xebd   :  { %v5746_v34 = vpop.f32.mrb[29].mxu0 }
 0xf3d   :  { %v2411_v28 = vpop.xlane.xlu0 %2410 }
 0xf3e   :  { %v2413_v35 = vsub.f32 %v2403_v15, %v2411_v28  ;;  %v2408_v37 = vpop.xlane.xlu1 %2407  ;;  %v2921_v28 = vmul.f32 %v5042_v0, %v5744_v27 }
 0xf3f   :  { %v2412_v39 = vsub.f32 %v2398_v17, %v2408_v37 }
 0xf40   :  { %v2416_v40 = vmul.f32 1.442695, %v2413_v35 }
 0xf41   :  { %v2414_v41 = vmul.f32 1.442695, %v2412_v39 }
 0xf42   :  { %5004 = vpow2.f32 %v2416_v40 }
 0xf43   :  { %5006 = vpow2.f32 %v2414_v41 }
 0xf4c   :  { %v5005_v42 = vpop.eup %5004 }
 0xf4d   :  { %v5007_v4 = vpop.eup %5006  ;;  %v2421_v10 = vsel %vm611_vm4, %v5005_v42, 0.0 }
 0xf4e   :  { %2422 = vadd.xlane.f32.xlu0 %v2421_v10  ;;  %v2418_v43 = vsel %vm611_vm4, %v5007_v4, 0.0 }
 0xf4f   :  { %2419 = vadd.xlane.f32.xlu1 %v2418_v43 }
 0xfdb   :  { %v2423_v46 = vpop.xlane.xlu0 %2422 }
 0xfdc   :  { %5008 = vrcp.f32 %v2423_v46  ;;  %v2420_v47 = vpop.xlane.xlu1 %2419 }
 0xfdd   :  { %5010 = vrcp.f32 %v2420_v47 }
 0xfe6   :  { %v5009_v49 = vpop.eup %5008 }
 0xfe7   :  { %v5011_v52 = vpop.eup %5010  ;;  %v2427_v55 = vmul.f32 %v5009_v49, %v5005_v42 }
 0xfe8   :  { %v2426_v53 = vmul.f32 %v5011_v52, %v5007_v4 }
 0xfea   :  { %4497 = vmatprep.mubr.msk.f32.mxu1 %vm611_vm4, %v2426_v53 }
 0xfeb   :  { %4498 = vmatmul.mubr.msk.f32.vlgmr.msra.gmra.mrb[24].mxu1 %vm611_vm4, %v2427_v55 }
 0xfec   :  { %4852 = vmatpush3.bf16.msra.mxu1 %v4849_v45  ;;  %4508 = vmatprep.mubr.msk.f32.mxu1 %vm173_vm3, %v5654_v30 }
 0xfed   :  { %4854 = vmatprep.subr.bf16.mxu1 %v4853_v56 }
 0xff0   :  { %4856 = vmatpush3.bf16.msra.mxu1 %v4853_v56  ;;  %v3946_v56 = vld [vmem:[%s5988_s12 + $0x30] sm:$0xff] }
 0xff1   :  { %4866 = vmatprep.subr.bf16.mxu1 %v4865_v60  ;;  %v4899_v58 = vpack.c.bf16 %v3947_v57, %v3946_v56  ;;  %v3971_v57 = vld [vmem:[%s5992_s16 + $0x70] sm:$0xff] }
 0xff3   :  { %4509 = vmatmul.mubr.msk.f32.vlgmr.msra.gmra.mrb[26].mxu1 %vm173_vm3, %v5656_v32 }
 0xff4   :  { %4868 = vmatpush3.bf16.msra.mxu1 %v4865_v60  ;;  %4530 = vmatprep.mubr.msk.f32.mxu1 %vm173_vm3, %v5654_v30 }
 0xff5   :  { %4870 = vmatprep.subr.bf16.mxu1 %v4869_v1 }
 0xff8   :  { %4872 = vmatpush3.bf16.msra.mxu1 %v4869_v1 }
 0xff9   :  { %4882 = vmatprep.subr.bf16.mxu1 %v4881_v12 }
 0xffb   :  { %4531 = vmatmul.mubr.msk.f32.vlgmr.msra.gmra.mrb[28].mxu1 %vm173_vm3, %v5656_v32 }
 0xffc   :  { %4884 = vmatpush3.bf16.msra.mxu1 %v4881_v12  ;;  %4552 = vmatprep.mubr.msk.f32.mxu1 %vm173_vm3, %v5654_v30  ;;  %v5043_v30 = vld [vmem:[%s5979_s3 + $0x8] sm:$0xff]  ;;  %v3908_v12 = vld [vmem:[%s5988_s12 + $0x20] sm:$0xff] }
 0xffd   :  { %4886 = vmatprep.subr.bf16.mxu1 %v4885_v25  ;;  %v4903_v24 = vpack.c.bf16 %v3909_v21, %v3908_v12 }
0x1000   :  { %4888 = vmatpush3.bf16.msra.mxu1 %v4885_v25 }
0x1003   :  { %4553 = vmatmul.mubr.msk.f32.vlgmr.msra.gmra.mrb[30].mxu1 %vm173_vm3, %v5656_v32  ;;  %v5044_v32 = vld [vmem:[%s5980_s4] sm:$0xff] }
0x1004   :  { %v2914_v15 = vmul.f32 %v5044_v32, %v5742_v33  ;;  %v2920_v39 = vmul.f32 %v5044_v32, %v5746_v34 }
0x10be   :  { %v5800_v26 = vpop.f32.mrb[24].mxu1 }
0x10bf   :  { %v5802_v59 = vpop.f32.mrb[25].mxu1 }
0x10c6   :  { %v4510_v13 = vpop.f32.mrb[26].mxu1 }
0x10c7   :  { %v2913_v23 = vmul.f32 %v5043_v30, %v4510_v13  ;;  %v2583_v63 = vpop.f32.mrb[27].mxu1 }
0x10c8   :  { %v2912_v17 = vmul.f32 %v5045_v2, %v2583_v63 }
0x10c9   :  { %v2917_v29 = vadd.f32 %v2915_v22, %v2913_v23 }
0x10ca   :  { %v2916_v19 = vadd.f32 %v2914_v15, %v2912_v17  ;;  %v3960_v17 = vld [vmem:[%s5991_s15 + $0x28] sm:$0xff] }
0x10cc   :  { %4559 = vmatprep.mubr.msk.f32.mxu0 %vm611_vm4, %v2916_v19  ;;  %v3955_v19 = vld [vmem:[%s5990_s14 + $0x30] sm:$0xff] }
0x10ce   :  { %v4532_v20 = vpop.f32.mrb[28].mxu1 }
0x10cf   :  { %v2919_v35 = vmul.f32 %v5043_v30, %v4532_v20  ;;  %v2743_v37 = vpop.f32.mrb[29].mxu1  ;;  %v3956_v20 = vld [vmem:[%s5990_s14 + $0x38] sm:$0xff] }
0x10d0   :  { %v2918_v40 = vmul.f32 %v5045_v2, %v2743_v37  ;;  %v3962_v37 = vld [vmem:[%s5991_s15 + $0x38] sm:$0xff] }
0x10d1   :  { %v2923_v41 = vadd.f32 %v2921_v28, %v2919_v35  ;;  %v3961_v28 = vld [vmem:[%s5991_s15 + $0x30] sm:$0xff]  ;;  %v4911_v35 = vpack.c.bf16 %v3956_v20, %v3955_v19 }
0x10d2   :  { %v2922_v42 = vadd.f32 %v2920_v39, %v2918_v40  ;;  %v4919_v39 = vpack.c.bf16 %v3962_v37, %v3961_v28 }
0x10d4   :  { %v4889_v33 = vpack.c.bf16 %v2923_v41, %v2922_v42 }
0x10d6   :  { %v4554_v4 = vpop.f32.mrb[30].mxu1  ;;  %4891 = vmatprep.subr.msk.bf16.mxu0 %vm5361_vm5, %v4889_v33 }
0x10d7   :  { %v2903_v10 = vpop.f32.mrb[31].mxu1  ;;  %4894 = vmatpush3.bf16.xpose.msk.msra.mxu0 %vm5361_vm5, %v4889_v33 }
0x10d8   :  { %v4895_v43 = vpack.c.bf16 %v4554_v4, %v2903_v10  ;;  %4900 = vmatprep.subr.bf16.mxu0 %v4899_v58 }
0x10da   :  { %4896 = vmatprep.subr.bf16.mxu1 %v4895_v43 }
0x10db   :  { %4898 = vmatpush3.bf16.msra.mxu1 %v4895_v43  ;;  %v3952_v43 = vld [vmem:[%s6007_s2 + $0x1] sm:$0x1] }
0x10de   :  { %4560 = vmatmul.mubr.msk.f32.vlgmr.msra.gmra.mrb[30].mxu0 %vm611_vm4, %v2917_v29 }
0x10df   :  { %4902 = vmatpush3.bf16.msra.mxu0 %v4899_v58  ;;  %v3972_v58 = vld [vmem:[%s5992_s16 + $0x78] sm:$0xff] }
0x10e0   :  { %4904 = vmatprep.subr.bf16.mxu0 %v4903_v24 }
0x11b1   :  { %v4561_v27 = vpop.f32.mrb[30].mxu0 }
0x11b2   :  { %v3008_v34 = vadd.f32 %v4561_v27, %v5415_v5  ;;  %v3002_v31 = vpop.f32.mrb[31].mxu0  ;;  %v3299_v27 = vadd.f32 1.0, %v3952_v43 }
0x11b3   :  { %v3003_v44 = vadd.f32 %v3002_v31, %v5420_v6 }
0x11b4   :  { %v3014_v45 = vsel %vm611_vm4, %v3008_v34, -inf  ;;  %v3304_v31 = vrot.slane %v3299_v27, %v5271_v54 }
0x11b5   :  { %3015 = vmax.xlane.f32.xlu0 %v3014_v45  ;;  %v3011_v46 = vsel %vm611_vm4, %v3003_v44, -inf }
0x11b6   :  { %3012 = vmax.xlane.f32.xlu1 %v3011_v46 }
0x1242   :  { %v3016_v47 = vpop.xlane.xlu0 %3015 }
0x1243   :  { %v3018_v48 = vsub.f32 %v3008_v34, %v3016_v47  ;;  %v3013_v49 = vpop.xlane.xlu1 %3012 }
0x1244   :  { %v3017_v50 = vsub.f32 %v3003_v44, %v3013_v49  ;;  %v3965_v49 = vld [vmem:[%s5992_s16 + $0x40] sm:$0xff] }
0x1245   :  { %v3021_v51 = vmul.f32 1.442695, %v3018_v48 }
0x1246   :  { %v3019_v52 = vmul.f32 1.442695, %v3017_v50  ;;  %v3966_v50 = vld [vmem:[%s5992_s16 + $0x48] sm:$0xff] }
0x1247   :  { %5012 = vpow2.f32 %v3021_v51  ;;  %v4923_v51 = vpack.c.bf16 %v3966_v50, %v3965_v49 }
0x1248   :  { %5014 = vpow2.f32 %v3019_v52  ;;  %v3967_v52 = vld [vmem:[%s5992_s16 + $0x50] sm:$0xff] }
0x1251   :  { %v5013_v53 = vpop.eup %5012 }
0x1252   :  { %v5015_v55 = vpop.eup %5014  ;;  %v3026_v5 = vsel %vm611_vm4, %v5013_v53, 0.0 }
0x1253   :  { %3027 = vadd.xlane.f32.xlu0 %v3026_v5  ;;  %v3023_v6 = vsel %vm611_vm4, %v5015_v55, 0.0  ;;  %v3969_v5 = vld [vmem:[%s5992_s16 + $0x60] sm:$0xff] }
0x1254   :  { %3024 = vadd.xlane.f32.xlu1 %v3023_v6  ;;  %v3970_v6 = vld [vmem:[%s5992_s16 + $0x68] sm:$0xff] }
0x1255   :  { %v4931_v56 = vpack.c.bf16 %v3970_v6, %v3969_v5 }
0x12e0   :  { %v3028_v60 = vpop.xlane.xlu0 %3027 }
0x12e1   :  { %5016 = vrcp.f32 %v3028_v60  ;;  %v3025_v61 = vpop.xlane.xlu1 %3024  ;;  %v4935_v60 = vpack.c.bf16 %v3972_v58, %v3971_v57 }
0x12e2   :  { %5018 = vrcp.f32 %v3025_v61 }
0x12eb   :  { %v5017_v62 = vpop.eup %5016 }
0x12ec   :  { %v5019_v1 = vpop.eup %5018  ;;  %v3032_v9 = vmul.f32 %v5017_v62, %v5013_v53  ;;  %v3968_v53 = vld [vmem:[%s5992_s16 + $0x58] sm:$0xff] }
0x12ed   :  { %v3031_v3 = vmul.f32 %v5019_v1, %v5015_v55  ;;  %v4927_v55 = vpack.c.bf16 %v3968_v53, %v3967_v52 }
0x12ef   :  { %4566 = vmatprep.mubr.msk.f32.mxu1 %vm611_vm4, %v3031_v3 }
0x12f0   :  { %4567 = vmatmul.mubr.msk.f32.vlgmr.msra.gmra.mrb[32].mxu1 %vm611_vm4, %v3032_v9 }
0x13c3   :  { %v4568_v25 = vpop.f32.mrb[32].mxu1 }
0x13c4   :  { %v3105_v13 = vpop.f32.mrb[33].mxu1 }
0x13c5   :  { %4573 = vmatprep.mubr.msk.f32.mxu0 %vm611_vm4, %v3105_v13 }
0x13c6   :  { %4574 = vmatmul.mubr.msk.f32.vlgmr.msra.gmra.mrb[32].mxu0 %vm611_vm4, %v4568_v25 }
0x13c7   :  { %4906 = vmatpush3.bf16.msra.mxu0 %v4903_v24  ;;  %4580 = vmatprep.mubr.msk.f32.mxu0 %vm611_vm4, %v5802_v59 }
0x13ce   :  { %4581 = vmatmul.mubr.msk.f32.vlgmr.msra.gmra.mrb[32].mxu0 %vm611_vm4, %v5800_v26  ;;  %v3959_v26 = vld [vmem:[%s5991_s15 + $0x20] sm:$0xff] }
0x13cf   :  { %v4915_v29 = vpack.c.bf16 %v3960_v17, %v3959_v26 }
0x13d1   :  { %4916 = vmatprep.subr.bf16.mxu0 %v4915_v29 }
0x13d2   :  { %4918 = vmatpush3.bf16.msra.mxu0 %v4915_v29 }
0x13d3   :  { %4920 = vmatprep.subr.bf16.mxu0 %v4919_v39 }
0x13d6   :  { %4922 = vmatpush3.bf16.msra.mxu0 %v4919_v39 }
0x13d7   :  { %4941 = vmatprep.subr.msk.bf16.mxu0 %vm4940_vm6, %v5186_v7 }
0x14a1   :  { %v4582_v0 = vpop.f32.mrb[32].mxu0 }
0x14a2   :  { %v5853_v22 = vadd.f32 %v4582_v0, %v5589_v36  ;;  %v3270_v30 = vpop.f32.mrb[33].mxu0  ;;  %v3953_v36 = vld [vmem:[%s5990_s14 + $0x20] sm:$0xff] }
0x14a3   :  { %v5856_v23 = vadd.f32 %v3270_v30, %v5592_v38  ;;  %v3954_v38 = vld [vmem:[%s5990_s14 + $0x28] sm:$0xff] }
0x14a4   :  { %v3284_v63 = vmul.f32 %v5853_v22, %v5853_v22  ;;  %v4907_v2 = vpack.c.bf16 %v3954_v38, %v3953_v36 }
0x14a5   :  { %v3283_v32 = vmul.f32 %v5856_v23, %v5856_v23 }
0x14a6   :  { %v3288_v15 = vsel %vm173_vm3, %v3284_v63, 0.0  ;;  %4908 = vmatprep.subr.bf16.mxu1 %v4907_v2 }
0x14a7   :  { %3289 = vadd.xlane.f32.xlu0 %v3288_v15  ;;  %v3285_v59 = vsel %vm173_vm3, %v3283_v32, 0.0  ;;  %4910 = vmatpush3.bf16.msra.mxu1 %v4907_v2 }
0x14a8   :  { %3286 = vadd.xlane.f32.xlu1 %v3285_v59  ;;  %4912 = vmatprep.subr.bf16.mxu1 %v4911_v35 }
0x14ab   :  { %4914 = vmatpush3.bf16.msra.mxu1 %v4911_v35 }
0x14ac   :  { %4924 = vmatprep.subr.bf16.mxu1 %v4923_v51 }
0x1534   :  { %v3290_v40 = vpop.xlane.xlu0 %3289 }
0x1535   :  { %v3292_v41 = vmul.f32 0.03125, %v3290_v40  ;;  %v3287_v42 = vpop.xlane.xlu1 %3286 }
0x1536   :  { %v3291_v33 = vmul.f32 0.03125, %v3287_v42 }
0x1537   :  { %v3294_v4 = vadd.f32 1e-06, %v3292_v41 }
0x1538   :  { %v3293_v10 = vadd.f32 1e-06, %v3291_v33 }
0x1539   :  { %5020 = vrsqrt.f32 %v3294_v4 }
0x153a   :  { %5022 = vrsqrt.f32 %v3293_v10 }
0x1543   :  { %v5021_v34 = vpop.eup %5020 }
0x1544   :  { %v5023_v44 = vpop.eup %5022  ;;  %v3298_v45 = vmul.f32 %v5021_v34, %v5853_v22 }
0x1545   :  { %v3297_v46 = vmul.f32 %v5023_v44, %v5856_v23 }
0x1546   :  { %v3307_v48 = vmul.f32 %v3304_v31, %v3298_v45 }
0x1547   :  { %v3306_v47 = vmul.f32 %v3304_v31, %v3297_v46 }
0x1549   :  { %4591 = vmatprep.mubr.msk.f32.mxu1 %vm173_vm3, %v3306_v47  ;;  %4602 = vmatprep.mubr.msk.f32.mxu0 %vm173_vm3, %v3306_v47 }
0x154a   :  { %4592 = vmatmul.mubr.msk.f32.vlgmr.msra.gmra.mrb[34].mxu1 %vm173_vm3, %v3307_v48  ;;  %4603 = vmatmul.mubr.msk.f32.vlgmr.msra.gmra.mrb[34].mxu0 %vm173_vm3, %v3307_v48 }
0x154b   :  { %4926 = vmatpush3.bf16.msra.mxu1 %v4923_v51  ;;  %4944 = vmatpush3.bf16.xpose.msk.msra.mxu0 %vm4940_vm6, %v5186_v7  ;;  %v3718_v51 = vld [vmem:[%s6008_s5 + $0x8] sm:$0xff] }
0x154c   :  { %4928 = vmatprep.subr.bf16.mxu1 %v4927_v55  ;;  %4947 = vmatprep.subr.msk.bf16.mxu0 %vm4940_vm6, %v5188_v8  ;;  %vm3760_vm10 = vcmp.ne.s32.totalorder %v3718_v51, 0 }
0x154f   :  { %4930 = vmatpush3.bf16.msra.mxu1 %v4927_v55 }
0x1550   :  { %4932 = vmatprep.subr.bf16.mxu1 %v4931_v56 }
0x1553   :  { %4934 = vmatpush3.bf16.msra.mxu1 %v4931_v56  ;;  %4950 = vmatpush3.bf16.xpose.msk.msra.mxu0 %vm4940_vm6, %v5188_v8 }
0x1554   :  { %4936 = vmatprep.subr.bf16.mxu1 %v4935_v60  ;;  %4953 = vmatprep.subr.msk.bf16.mxu0 %vm4940_vm6, %v5199_v11 }
0x1557   :  { %4938 = vmatpush3.bf16.msra.mxu1 %v4935_v60 }
0x155b   :  { %4956 = vmatpush3.bf16.xpose.msk.msra.mxu0 %vm4940_vm6, %v5199_v11 }
0x155c   :  { %4959 = vmatprep.subr.msk.bf16.mxu0 %vm4940_vm6, %v5209_v14 }
0x1563   :  { %4962 = vmatpush3.bf16.xpose.msk.msra.mxu0 %vm4940_vm6, %v5209_v14 }
0x161d   :  { %v4593_v61 = vpop.f32.mrb[34].mxu1  ;;  %v4604_v62 = vpop.f32.mrb[34].mxu0 }
0x161e   :  { %v3477_v1 = vmul.f32 0.044715, %v4593_v61  ;;  %v3385_v3 = vpop.f32.mrb[35].mxu1  ;;  %v3465_v9 = vpop.f32.mrb[35].mxu0  ;;  %v3475_v36 = vmul.f32 0.5, %v4593_v61 }
0x161f   :  { %v3476_v12 = vmul.f32 0.044715, %v3385_v3  ;;  %v3474_v26 = vmul.f32 0.5, %v3385_v3 }
0x1620   :  { %v3479_v21 = vmul.f32 %v4593_v61, %v3477_v1 }
0x1621   :  { %v3478_v24 = vmul.f32 %v3476_v12, %v3385_v3 }
0x1622   :  { %v3481_v25 = vmul.f32 %v4593_v61, %v3479_v21 }
0x1623   :  { %v3480_v13 = vmul.f32 %v3478_v24, %v3385_v3  ;;  %v3986_v24 = vsel %vm3760_vm10, 1.0, %v5071_v18 }
0x1624   :  { %v3483_v0 = vadd.f32 %v4593_v61, %v3481_v25  ;;  %v3778_v25 = vsel %vm3767_vm11, %v3986_v24, 0.0 }
0x1625   :  { %v3482_v30 = vadd.f32 %v3480_v13, %v3385_v3 }
0x1626   :  { %v3485_v63 = vmul.f32 0.7978846, %v3483_v0 }
0x1627   :  { %v3484_v32 = vmul.f32 0.7978846, %v3482_v30 }
0x1628   :  { %5024 = vtanh.f32 %v3485_v63 }
0x1629   :  { %5026 = vtanh.f32 %v3484_v32 }
0x1632   :  { %v5025_v15 = vpop.eup %5024 }
0x1633   :  { %v5027_v59 = vpop.eup %5026  ;;  %v3489_v38 = vadd.f32 1.0, %v5025_v15 }
0x1634   :  { %v3488_v2 = vadd.f32 1.0, %v5027_v59 }
0x1635   :  { %v3491_v17 = vmul.f32 %v3489_v38, %v3475_v36 }
0x1636   :  { %v3490_v29 = vmul.f32 %v3488_v2, %v3474_v26 }
0x1637   :  { %v3493_v19 = vmul.f32 %v4604_v62, %v3491_v17 }
0x1638   :  { %v3492_v20 = vmul.f32 %v3490_v29, %v3465_v9 }
0x163a   :  { %4621 = vmatprep.mubr.msk.f32.mxu1 %vm82_vm0, %v3492_v20 }
0x163b   :  { %4622 = vmatmul.mubr.msk.f32.vlgmr.msra.gmra.mrb[36].mxu1 %vm82_vm0, %v3493_v19 }
0x170e   :  { %v4623_v28 = vpop.f32.mrb[36].mxu1 }
0x170f   :  { %v3585_v35 = vadd.f32 %v4623_v28, %v5853_v22  ;;  %v3575_v37 = vpop.f32.mrb[37].mxu1  ;;  %v3586_v22 = vld [vmem:[%s5993_s17] sm:$0x1] }
0x1710   :  { %v3584_v39 = vadd.f32 %v3575_v37, %v5856_v23  ;;  %v3603_v23 = vadd.f32 1.0, %v3586_v22 }
0x1711   :  { %v3588_v40 = vmul.f32 %v3585_v35, %v3585_v35 }
0x1712   :  { %v3587_v7 = vmul.f32 %v3584_v39, %v3584_v39  ;;  %v3608_v27 = vrot.slane %v3603_v23, %v5271_v54  ;;  %v3717_v54 = vld [vmem:[%s6008_s5] sm:$0xff] }
0x1713   :  { %v3592_v41 = vsel %vm173_vm3, %v3588_v40, 0.0  ;;  %vm3759_vm9 = vcmp.ne.s32.totalorder %v3717_v54, 0 }
0x1714   :  { %3593 = vadd.xlane.f32.xlu0 %v3592_v41  ;;  %v3589_v8 = vsel %vm173_vm3, %v3587_v7, 0.0 }
0x1715   :  { %3590 = vadd.xlane.f32.xlu1 %v3589_v8 }
0x17a1   :  { %v3594_v42 = vpop.xlane.xlu0 %3593 }
0x17a2   :  { %v3596_v11 = vmul.f32 0.03125, %v3594_v42  ;;  %v3591_v33 = vpop.xlane.xlu1 %3590 }
0x17a3   :  { %v3595_v4 = vmul.f32 0.03125, %v3591_v33 }
0x17a4   :  { %v3598_v10 = vadd.f32 1e-06, %v3596_v11 }
0x17a5   :  { %v3597_v14 = vadd.f32 1e-06, %v3595_v4 }
0x17a6   :  { %5028 = vrsqrt.f32 %v3598_v10 }
0x17a7   :  { %5030 = vrsqrt.f32 %v3597_v14 }
0x17b0   :  { %v5029_v43 = vpop.eup %5028 }
0x17b1   :  { %v5031_v34 = vpop.eup %5030  ;;  %v3602_v31 = vmul.f32 %v5029_v43, %v3585_v35 }
0x17b2   :  { %v3601_v44 = vmul.f32 %v5031_v34, %v3584_v39 }
0x17b3   :  { %v3611_v46 = vmul.f32 %v3608_v27, %v3602_v31 }
0x17b4   :  { %v3610_v45 = vmul.f32 %v3608_v27, %v3601_v44 }
0x17b6   :  { %4640 = vmatprep.mubr.msk.f32.mxu0 %vm173_vm3, %v3610_v45 }
0x17b7   :  { %4641 = vmatmul.mubr.msk.f32.vlgmr.msra.gmra.mrb[36].mxu0 %vm173_vm3, %v3611_v46 }
0x188a   :  { %v4642_v47 = vpop.f32.mrb[36].mxu0 }
0x188b   :  { %v3708_v48 = vpop.f32.mrb[37].mxu0  ;;  %v3722_v49 = vsel %vm82_vm0, %v4642_v47, -inf }
0x188c   :  { %3723 = vmax.xlane.f32.xlu0 %v3722_v49  ;;  %v3719_v50 = vsel %vm82_vm0, %v3708_v48, -inf }
0x188d   :  { %3720 = vmax.xlane.f32.xlu1 %v3719_v50 }
0x189e   :  { %3742 = vperm.xlu1 %4971, %v3717_v54  }
0x18a2   :  { %3745 = vperm.xlu0 %4970, %v3718_v51  }
0x1919   :  { %v3724_v52 = vpop.xlane.xlu0 %3723 }
0x191a   :  { %v3726_v53 = vsub.f32 %v4642_v47, %v3724_v52  ;;  %v3721_v55 = vpop.xlane.xlu1 %3720 }
0x191b   :  { %v3725_v5 = vsub.f32 %v3708_v48, %v3721_v55 }
0x191c   :  { %v3729_v6 = vmul.f32 1.442695, %v3726_v53 }
0x191d   :  { %v3727_v56 = vmul.f32 1.442695, %v3725_v5 }
0x191e   :  { %5032 = vpow2.f32 %v3729_v6  ;;  %v3743_v58 = vpop.permute.xlu1 %3742 }
0x191f   :  { %5034 = vpow2.f32 %v3727_v56  ;;  %vm3747_vm8 = vcmp.eq.s32.totalorder %v5214_v16, %v3743_v58 }
0x1920   :  { %v3749_v9 = vsel %vm3747_vm8, %v3725_v5, 0.0 }
0x1921   :  { %v3746_v57 = vpop.permute.xlu0 %3745  ;;  %v3751_v21 = vsel %vm82_vm0, %v3749_v9, 0.0 }
0x1922   :  { %vm3748_vm7 = vcmp.eq.s32.totalorder %v5214_v16, %v3746_v57  ;;  %v3985_v16 = vsel %vm3759_vm9, 1.0, %v5071_v18 }
0x1923   :  { %v3750_v3 = vsel %vm3748_vm7, %v3726_v53, 0.0  ;;  %v3777_v13 = vsel %vm3767_vm11, %v3985_v16, 0.0 }
0x1924   :  { %v3754_v12 = vsel %vm82_vm0, %v3750_v3, 0.0  ;;  %v3779_v0 = vadd.f32 %v3778_v25, %v3777_v13 }
0x1926   :  { %v3780_v30 = vrot.slane %v3779_v0, 4 }
0x1928   :  { %v5033_v60 = vpop.eup %5032  ;;  %v3781_v63 = vadd.f32 %v3780_v30, %v3779_v0 }
0x1929   :  { %v5035_v61 = vpop.eup %5034  ;;  %v3734_v62 = vsel %vm82_vm0, %v5033_v60, 0.0 }
0x192a   :  { %3735 = vadd.xlane.f32.xlu0 %v3734_v62  ;;  %v3731_v1 = vsel %vm82_vm0, %v5035_v61, 0.0  ;;  %v3782_v59 = vrot.slane %v3781_v63, 2 }
0x192b   :  { %3732 = vadd.xlane.f32.xlu1 %v3731_v1 }
0x192c   :  { %v3783_v36 = vadd.f32 %v3782_v59, %v3781_v63 }
0x192e   :  { %3755 = vadd.xlane.f32.xlu0 %v3754_v12  ;;  %v3784_v38 = vrot.slane %v3783_v36, 1 }
0x192f   :  { %3752 = vadd.xlane.f32.xlu1 %v3751_v21 }
0x1930   :  { %v3785_v18 = vadd.f32 %v3784_v38, %v3783_v36 }
0x1932   :  { %v3786_v39 = vmax.f32 %v3785_v18, 1.0 }
0x19b7   :  { %v3736_v32 = vpop.xlane.xlu0 %3735 }
0x19b8   :  { %5036 = vlog2.f32 %v3736_v32  ;;  %v3733_v15 = vpop.xlane.xlu1 %3732 }
0x19b9   :  { %5038 = vlog2.f32 %v3733_v15 }
0x19ba   :  { %5040 = vrcp.f32 %v3786_v39 }
0x19bb   :  { %v3756_v29 = vpop.xlane.xlu0 %3755 }
0x19bc   :  { %v3753_v28 = vpop.xlane.xlu1 %3752 }
0x19c2   :  { %v5037_v26 = vpop.eup %5036 }
0x19c3   :  { %v5039_v2 = vpop.eup %5038  ;;  %v3740_v17 = vmul.f32 0.6931472, %v5037_v26 }
0x19c4   :  { %v3738_v19 = vmul.f32 0.6931472, %v5039_v2  ;;  %v5041_v14 = vpop.eup %5040 }
0x19c5   :  { %v3758_v20 = vsub.f32 %v3740_v17, %v3756_v29 }
0x19c6   :  { %v3757_v35 = vsub.f32 %v3738_v19, %v3753_v28 }
0x19c7   :  { %v3766_v37 = vmul.f32 %v3986_v24, %v3758_v20 }
0x19c8   :  { %v3765_v40 = vmul.f32 %v3985_v16, %v3757_v35 }
0x19c9   :  { %v3769_v7 = vsel %vm3767_vm11, %v3766_v37, 0.0 }
0x19ca   :  { %v3768_v41 = vsel %vm3767_vm11, %v3765_v40, 0.0 }
0x19cb   :  { %v3770_v8 = vadd.f32 %v3769_v7, %v3768_v41 }
0x19cd   :  { %v3771_v42 = vrot.slane %v3770_v8, 4 }
0x19cf   :  { %v3772_v11 = vadd.f32 %v3771_v42, %v3770_v8 }
0x19d1   :  { %v3773_v33 = vrot.slane %v3772_v11, 2 }
0x19d3   :  { %v3774_v4 = vadd.f32 %v3773_v33, %v3772_v11 }
0x19d5   :  { %v3775_v10 = vrot.slane %v3774_v4, 1 }
0x19d7   :  { %v3776_v22 = vadd.f32 %v3775_v10, %v3774_v4 }
0x19d9   :  { %v3788_v23 = vmul.f32 %v5041_v14, %v3776_v22 }
0x19db   :  { %3790 = vst.msk [vmem:[#allocation2] sm:$0x1] %vm3789_vm12, %v3788_v23 }
0x19dc   :  { %5057 = shalt.err (!%p5054_p4)
}
0x19dd   :  { %s5058_s22 = scalar_lea.hbm %s5994_s18, 16 }
0x19de   :  { %p5059_p5 = scmp.ne.s32.totalorder %s5994_s18, %s5058_s22  ;;  %p5062_p6 = scmp.lt.u32.totalorder %s5058_s22, %s5994_s18 }
0x19e0   :  { %p5064_p7 = pnand %p5062_p6, %p5059_p5 }
0x19e2   :  { %5067 = shalt.err (!%p5064_p7)
}
0x19e3   :  { %3800 = dma.vmem_to_hbm [thread:$0]  %s3798_s13, 16, %s5994_s18, [#allocation3]  }
0x19e4   :  { %5068 = dma.done.wait [#allocation3], 16  }
0x19e5   :  { %5069 = vsyncadd [#allocation3], 4294967280 }
0x19e6   :  { %3804 = vsyncpa [#allocation3], 1 }

</bundles_post_ra>
